<compile_context>
chip_gen: v5e
topology: v5e:2x2
jax: 0.10.0
libtpu: 0.0.40
codegen_flags: <defaults>
</compile_context>

<pallas_src>
import functools

import jax
import jax.numpy as jnp
from jax import lax
from jax.experimental import pallas as pl
from jax.experimental.pallas import tpu as pltpu

N_FFT = 200
HOP = 20
R = N_FFT // HOP                  # 10 hop-chunks per frame
N_FREQ = N_FFT // 2 + 1           # 101 (onesided)
F_PAD = 128                       # lane-padded freq bins per (real | imag) half
BN_EPS = 1e-5
LEAKY_SLOPE = 0.01                # nn.LeakyReLU() default
VMEM_LIMIT = 32 * 1024 * 1024     # keep every pallas_call v7x-safe (64 MiB phys)
TIME_CHUNK = 512                  # in-kernel register-pressure bound for the conv


def _round_up(v, m):
    return (v + m - 1) // m * m


# ------------------------------- STFT kernel --------------------------------

def _stft_kernel(chunk_ref, basis_ref, o_ref, gather_ref, *, tf):
    """One signal x one tile of `tf` frames -> one K=200 MXU matmul.

    chunk_ref : (1, n_chunks, HOP) hop-chunk view of the reflect-padded signal.
    basis_ref : (N_FFT, 2*F_PAD) window-folded ortho DFT basis (real|imag).
    o_ref     : (1, tf, 2*F_PAD) spectrum rows.
    gather_ref: (tf, 2*F_PAD) VMEM scratch holding the gathered frame tile.
    """
    fi = pl.program_id(1)
    t0 = fi * tf
    if tf % 8 == 0:                                   # tf==n_frames => single tile
        t0 = pl.multiple_of(t0, 8)
    # One aligned slab load; all further addressing is static.
    slab = chunk_ref[0, pl.ds(t0, tf + 16), :]        # (tf+16, HOP)
    for j in range(R):                                # static unroll (10)
        gather_ref[:, j * HOP:(j + 1) * HOP] = slab[j:j + tf, :]
    o_ref[0] = jnp.dot(gather_ref[:, :N_FFT], basis_ref[...],
                       preferred_element_type=jnp.float32)


def stft_pallas(chunks, basis, n_frames, tf):
    n_sig, n_chunks, hop = chunks.shape
    n_frame_tiles = pl.cdiv(n_frames, tf)
    kernel = functools.partial(_stft_kernel, tf=tf)
    return pl.pallas_call(
        kernel,
        out_shape=jax.ShapeDtypeStruct((n_sig, n_frames, 2 * F_PAD), jnp.float32),
        grid=(n_sig, n_frame_tiles),
        in_specs=[pl.BlockSpec((1, n_chunks, hop), lambda s, f: (s, 0, 0)),
                  pl.BlockSpec((N_FFT, 2 * F_PAD), lambda s, f: (0, 0))],
        out_specs=pl.BlockSpec((1, tf, 2 * F_PAD), lambda s, f: (s, f, 0)),
        scratch_shapes=[pltpu.VMEM((tf, 2 * F_PAD), jnp.float32)],
        compiler_params=pltpu.CompilerParams(
            dimension_semantics=("parallel", "parallel"),
            vmem_limit_bytes=VMEM_LIMIT),
    )(chunks, basis)


# --------------------------- DilConv (pass 1 of BN) --------------------------

def _dilconv_kernel(x_ref, band_ref, y_ref, stat_ref, *, n_t):
    """LeakyReLU -> 3x3 depthwise conv -> 1x1 conv, plus BN sum/sumsq partials.

    x_ref   : (sig_tile, n_t+2, F_PAD) time-padded lane-half (real or imag).
    band_ref: (3, F_PAD, F_PAD) banded freq-tap matrices (one per time tap,
              1x1 conv folded in, columns >= N_FREQ zeroed).
    y_ref   : (sig_tile, n_t, F_PAD) conv output (un-normalized).
    stat_ref: (1, 1, F_PAD) lane 0 = sum, lane 1 = sumsq of this block.
    """
    s_tile = x_ref.shape[0]
    total = jnp.float32(0.0)
    total_sq = jnp.float32(0.0)
    for s in range(s_tile):                                    # static unroll
        for c0 in range(0, n_t, TIME_CHUNK):                   # bound vreg use
            tc = min(TIME_CHUNK, n_t - c0)
            xs = x_ref[s, c0:c0 + tc + 2, :]                   # (tc+2, 128)
            act = jnp.where(xs >= 0.0, xs, LEAKY_SLOPE * xs)   # leaky(0)=0 keeps pads 0
            acc = jnp.dot(act[0:tc, :], band_ref[0],
                          preferred_element_type=jnp.float32)
            acc = acc + jnp.dot(act[1:tc + 1, :], band_ref[1],
                                preferred_element_type=jnp.float32)
            acc = acc + jnp.dot(act[2:tc + 2, :], band_ref[2],
                                preferred_element_type=jnp.float32)
            y_ref[s, c0:c0 + tc, :] = acc
            total = total + jnp.sum(acc)
            total_sq = total_sq + jnp.sum(acc * acc)
    lane = lax.broadcasted_iota(jnp.int32, (1, F_PAD), 1)
    stat_ref[0, 0] = jnp.where(lane == 0, total,
                               jnp.where(lane == 1, total_sq, 0.0))


def _pick_sig_tile(n_sig, n_frames):
    """Largest divisor tile (<=8) whose double-buffered blocks fit the budget."""
    budget = 24 * 1024 * 1024
    for s in (8, 4, 2, 1):
        if n_sig % s:
            continue
        blk = 4 * F_PAD * (s * (n_frames + 2) + s * n_frames)
        if 2 * blk <= budget:
            return s
    return 1
    # TODO(synk): also tile the frames axis (with a 1-frame halo) for extremely
    # long signals; today only the signal axis is tiled.


def dilconv_pallas(spec_p, band, n_frames, sig_tile):
    """spec_p: (n_sig, n_frames+2, 2*F_PAD) time-padded spectrum."""
    n_sig = spec_p.shape[0]
    n_tiles = n_sig // sig_tile
    kernel = functools.partial(_dilconv_kernel, n_t=n_frames)
    return pl.pallas_call(
        kernel,
        out_shape=(jax.ShapeDtypeStruct((n_sig, n_frames, 2 * F_PAD), jnp.float32),
                   jax.ShapeDtypeStruct((n_tiles, 2, 1, F_PAD), jnp.float32)),
        grid=(n_tiles, 2),                       # (signal tiles, real/imag half)
        in_specs=[pl.BlockSpec((sig_tile, n_frames + 2, F_PAD),
                               lambda si, h: (si, 0, h)),
                  pl.BlockSpec((3, F_PAD, F_PAD), lambda si, h: (0, 0, 0))],
        out_specs=(pl.BlockSpec((sig_tile, n_frames, F_PAD),
                                lambda si, h: (si, 0, h)),
                   pl.BlockSpec((1, 1, 1, F_PAD), lambda si, h: (si, h, 0, 0))),
        compiler_params=pltpu.CompilerParams(
            dimension_semantics=("parallel", "parallel"),
            vmem_limit_bytes=VMEM_LIMIT),
    )(spec_p, band)


# ------------------------------- ISTFT kernel -------------------------------

def _istft_kernel(a_ref, b_ref, c_ref, o_ref):
    # BN normalize + synthesis window are folded into b_ref / c_ref constants.
    o_ref[...] = (jnp.dot(a_ref[...], b_ref[...],
                          preferred_element_type=jnp.float32) + c_ref[...])


def istft_pallas(a2, basis, shift_row, tm):
    m, k = a2.shape
    n = basis.shape[1]
    return pl.pallas_call(
        _istft_kernel,
        out_shape=jax.ShapeDtypeStruct((m, n), jnp.float32),
        grid=(m // tm,),
        in_specs=[pl.BlockSpec((tm, k), lambda i: (i, 0)),
                  pl.BlockSpec((k, n), lambda i: (0, 0)),
                  pl.BlockSpec((1, n), lambda i: (0, 0))],
        out_specs=pl.BlockSpec((tm, n), lambda i: (i, 0)),
        compiler_params=pltpu.CompilerParams(
            dimension_semantics=("parallel",),
            vmem_limit_bytes=VMEM_LIMIT),
    )(a2, basis, shift_row)


# -------------------------------- forward -----------------------------------

def stft_att_forward(x, params, stride=1):
    batch, ch, time_len, ech = x.shape
    T = time_len * ech
    n_sig = batch * ch
    sig = x.reshape(n_sig, T).astype(jnp.float32)
    n_frames = 1 + T // HOP                                  # center=True frame count

    w_dw = params[:9].reshape(3, 3)                          # depthwise 3x3 (freq-major)
    w_pw = params[9]                                         # pointwise 1x1
    gamma = params[10]
    beta = params[11]

    # ---- static window / DFT bases, lane-padded to 2*F_PAD = 256 ----
    n = jnp.arange(N_FFT, dtype=jnp.float32)
    f = jnp.arange(N_FREQ, dtype=jnp.float32)
    win = 0.5 - 0.5 * jnp.cos(2.0 * jnp.pi * n / N_FFT)      # periodic Hann(200)
    scale = 1.0 / jnp.sqrt(jnp.float32(N_FFT))               # normalized=True -> ortho
    ang = 2.0 * jnp.pi * jnp.outer(n, f) / N_FFT             # (200, 101)
    fwd_basis = jnp.zeros((N_FFT, 2 * F_PAD), jnp.float32)
    fwd_basis = fwd_basis.at[:, :N_FREQ].set(win[:, None] * jnp.cos(ang) * scale)
    fwd_basis = fwd_basis.at[:, F_PAD:F_PAD + N_FREQ].set(
        -win[:, None] * jnp.sin(ang) * scale)

    coef = jnp.where((f == 0) | (f == N_FREQ - 1), 1.0, 2.0)
    ang2 = 2.0 * jnp.pi * jnp.outer(f, n) / N_FFT            # (101, 200)
    inv_r = coef[:, None] * jnp.cos(ang2) * scale
    inv_i = -(coef[:, None] * jnp.sin(ang2) * scale)
    inv_i = inv_i.at[0].set(0.0).at[N_FREQ - 1].set(0.0)     # irfft drops DC/Nyq imag
    inv_basis = jnp.zeros((2 * F_PAD, 2 * F_PAD), jnp.float32)
    inv_basis = inv_basis.at[:N_FREQ, :N_FFT].set(inv_r)
    inv_basis = inv_basis.at[F_PAD:F_PAD + N_FREQ, :N_FFT].set(inv_i)
    win_row = jnp.zeros((1, 2 * F_PAD), jnp.float32).at[0, :N_FFT].set(win)

    # Banded (f_in, f_out) matrices: the 3 freq taps on the sub/main/super
    # diagonals, one matrix per time tap, 1x1 conv folded in, restricted to the
    # 101x101 valid block so conv output lanes >= N_FREQ stay exactly zero.
    validf = (jnp.arange(F_PAD) < N_FREQ).astype(jnp.float32)
    mask2 = validf[:, None] * validf[None, :]
    eyes = (jnp.eye(F_PAD, k=1, dtype=jnp.float32),          # f_in = f_out - 1
            jnp.eye(F_PAD, dtype=jnp.float32),               # f_in = f_out
            jnp.eye(F_PAD, k=-1, dtype=jnp.float32))         # f_in = f_out + 1
    band = jnp.stack(
        [(w_dw[0, dt] * eyes[0] + w_dw[1, dt] * eyes[1] + w_dw[2, dt] * eyes[2])
         * mask2 * w_pw for dt in range(3)], axis=0)         # (3, 128, 128)

    # ---- STFT: reflect pad (center=True) + in-kernel framing via hop chunks ----
    tf = n_frames if n_frames <= 128 else 128
    n_frame_tiles = pl.cdiv(n_frames, tf)
    n_chunks = n_frame_tiles * tf + 16                       # covers last tile's slab
    l_chunks = n_chunks * HOP
    padded = jnp.pad(sig, ((0, 0), (N_FFT // 2, N_FFT // 2)), mode="reflect")
    padded = jnp.pad(padded, ((0, 0), (0, l_chunks - (T + N_FFT))))
    chunks = padded.reshape(n_sig, n_chunks, HOP)            # free view, no expansion
    spec = stft_pallas(chunks, fwd_basis, n_frames, tf)      # (n_sig, n_frames, 256)

    # ---- DilConv on real/imag halves + BN partial sums (two-pass BN, pass 1) ----
    sig_tile = _pick_sig_tile(n_sig, n_frames)
    spec_p = jnp.pad(spec, ((0, 0), (1, 1), (0, 0)))         # conv time padding (glue)
    conv, stats = dilconv_pallas(spec_p, band, n_frames, sig_tile)

    # ---- BN batch stats (training mode, separate per half like the two
    #      independent self.net() calls); variance clamped at zero ----
    count = jnp.float32(n_sig * n_frames * N_FREQ)
    sums = stats[:, :, 0, 0].sum(axis=0)                     # (2,)
    sqs = stats[:, :, 0, 1].sum(axis=0)                      # (2,)
    mean = sums / count
    var = jnp.maximum(sqs / count - mean * mean, 0.0)
    bn_scale = gamma * lax.rsqrt(var + BN_EPS)               # (2,)
    bn_shift = beta - mean * bn_scale                        # (2,)

    # Fold BN affine + synthesis window into the ISTFT constants (pass 2 is free):
    # (a*s + b) @ Inv * w  ==  a @ (s[:,None]*Inv*w) + (b @ Inv)*w.
    half_idx = jnp.arange(2 * F_PAD) // F_PAD
    scale_vec = bn_scale[half_idx]                           # (256,)
    shift_vec = bn_shift[half_idx]                           # (256,)
    istft_basis = scale_vec[:, None] * inv_basis * win_row   # (256, 256)
    istft_shift = (shift_vec[None, :] @ inv_basis) * win_row  # (1, 256)

    # ---- ISTFT: tiled matmul over M = n_sig*n_frames rows ----
    m_rows = n_sig * n_frames
    if m_rows >= 4096:
        tm = 1024
    elif m_rows >= 512:
        tm = 512
    else:
        tm = _round_up(m_rows, 8)
    m_pad = _round_up(m_rows, tm)
    a2 = conv.reshape(m_rows, 2 * F_PAD)
    if m_pad != m_rows:
        a2 = jnp.pad(a2, ((0, m_pad - m_rows), (0, 0)))
    yframes = istft_pallas(a2, istft_basis, istft_shift, tm)  # (m_pad, 256)
    yframes = yframes[:m_rows, :N_FFT].reshape(n_sig, n_frames, N_FFT)
    # TODO(synk): optional bf16 matmul operands (STFT/ISTFT bases + conv output)
    # would roughly double MXU throughput; kept f32 pending accuracy validation.

    # ---- overlap-add via the hop-divides-nfft reshape trick (R shifted adds) ----
    y4 = yframes.reshape(n_sig, n_frames, R, HOP)
    full = jnp.zeros((n_sig, n_frames + R - 1, HOP), jnp.float32)
    env_full = jnp.zeros((n_frames + R - 1, HOP), jnp.float32)
    win2 = (win * win).reshape(R, HOP)
    for j in range(R):
        full = full.at[:, j:j + n_frames, :].add(y4[:, :, j, :])
        env_full = env_full.at[j:j + n_frames, :].add(win2[j])
    y_full = full.reshape(n_sig, -1)
    env = env_full.reshape(-1)
    start = N_FFT // 2
    out_len = HOP * (n_frames - 1)
    y = y_full[:, start:start + out_len] / env[start:start + out_len]

    # Right-pad to the original time-domain length, reshape, stride-slice.
    y = jnp.pad(y, ((0, 0), (0, T - out_len)))
    out = y.reshape(batch, ch, time_len, ech)
    return out[:, :, ::stride, ::stride]


# --------------------------------- driver -----------------------------------

if __name__ == "__main__":
    key = jax.random.PRNGKey(0)
    k_dw, k_pw, k_x = jax.random.split(key, 3)

    # DilConv(1,1,3,1,1) parameters (deterministic synthetic init):
    #   depthwise Conv2d(1,1,3) weight (3,3), pointwise Conv2d(1,1,1) weight (),
    #   BatchNorm2d(1, affine=True) gamma/beta (PyTorch default init: 1, 0).
    w_dw = 0.2 * jax.random.normal(k_dw, (3, 3), dtype=jnp.float32)
    w_pw = 1.0 + 0.1 * jax.random.normal(k_pw, (), dtype=jnp.float32)
    gamma = jnp.float32(1.0)
    beta = jnp.float32(0.0)
    params = jnp.concatenate([w_dw.reshape(-1), jnp.stack([w_pw, gamma, beta])])

    # Input: (batch, channel_in, time_len, Echannel); time_len*Echannel = 160.
    x = jax.random.normal(k_x, (2, 2, 8, 20), dtype=jnp.float32)

    fwd_fn = jax.jit(functools.partial(stft_att_forward, stride=1))
    out = jax.block_until_ready(fwd_fn(x, params))
    assert out.shape == x.shape, out.shape
    assert bool(jnp.all(jnp.isfinite(out)))
    print("KERNEL_OK")
</pallas_src>

<mosaic_0001>
module attributes {stable_mosaic.version = 11 : i64} {
  func.func @_stft_kernel(%arg0: i32, %arg1: i32, %arg2: memref<1x25x20xf32, #tpu.memory_space<vmem>>, %arg3: memref<200x256xf32, #tpu.memory_space<vmem>>, %arg4: memref<1x9x256xf32, #tpu.memory_space<vmem>>, %arg5: memref<9x256xf32, #tpu.memory_space<vmem>>) attributes {dimension_semantics = [#tpu.dimension_semantics<parallel>, #tpu.dimension_semantics<parallel>], iteration_bounds = array<i64: 4, 1>, scalar_prefetch = 0 : i64, scratch_operands = 1 : i64, tpu.core_type = #tpu.core_type<tc>, window_params = [{transform_indices = @transform_0, window_bounds = array<i64: 1, 25, 20>}, {pipeline_mode = #tpu.pipeline_mode<synchronous>, transform_indices = @transform_1, window_bounds = array<i64: 200, 256>}, {transform_indices = @transform_2, window_bounds = array<i64: 1, 9, 256>}]} {
    %c9_i32 = arith.constant 9 : i32
    %0 = arith.muli %arg1, %c9_i32 : i32
    %c0 = arith.constant 0 : index
    %1 = arith.index_cast %0 : i32 to index
    %c0_0 = arith.constant 0 : index
    %2 = vector.load %arg2[%c0, %1, %c0_0] : memref<1x25x20xf32, #tpu.memory_space<vmem>>, vector<1x25x20xf32>
    %3 = vector.shape_cast %2 : vector<1x25x20xf32> to vector<25x20xf32>
    %4 = vector.extract_strided_slice %3 {offsets = [0, 0], sizes = [9, 20], strides = [1, 1]} : vector<25x20xf32> to vector<9x20xf32>
    %c0_1 = arith.constant 0 : index
    %c0_2 = arith.constant 0 : index
    %5 = vector.load %arg5[%c0_1, %c0_2] : memref<9x256xf32, #tpu.memory_space<vmem>>, vector<9x20xf32>
    tpu.vector_store %arg5[%c0_1, %c0_2], %4 {strides = array<i32>} : memref<9x256xf32, #tpu.memory_space<vmem>>, vector<9x20xf32>,
    %6 = vector.extract_strided_slice %3 {offsets = [1, 0], sizes = [9, 20], strides = [1, 1]} : vector<25x20xf32> to vector<9x20xf32>
    %c0_3 = arith.constant 0 : index
    %c20 = arith.constant 20 : index
    %7 = vector.load %arg5[%c0_3, %c20] : memref<9x256xf32, #tpu.memory_space<vmem>>, vector<9x20xf32>
    tpu.vector_store %arg5[%c0_3, %c20], %6 {strides = array<i32>} : memref<9x256xf32, #tpu.memory_space<vmem>>, vector<9x20xf32>,
    %8 = vector.extract_strided_slice %3 {offsets = [2, 0], sizes = [9, 20], strides = [1, 1]} : vector<25x20xf32> to vector<9x20xf32>
    %c0_4 = arith.constant 0 : index
    %c40 = arith.constant 40 : index
    %9 = vector.load %arg5[%c0_4, %c40] : memref<9x256xf32, #tpu.memory_space<vmem>>, vector<9x20xf32>
    tpu.vector_store %arg5[%c0_4, %c40], %8 {strides = array<i32>} : memref<9x256xf32, #tpu.memory_space<vmem>>, vector<9x20xf32>,
    %10 = vector.extract_strided_slice %3 {offsets = [3, 0], sizes = [9, 20], strides = [1, 1]} : vector<25x20xf32> to vector<9x20xf32>
    %c0_5 = arith.constant 0 : index
    %c60 = arith.constant 60 : index
    %11 = vector.load %arg5[%c0_5, %c60] : memref<9x256xf32, #tpu.memory_space<vmem>>, vector<9x20xf32>
    tpu.vector_store %arg5[%c0_5, %c60], %10 {strides = array<i32>} : memref<9x256xf32, #tpu.memory_space<vmem>>, vector<9x20xf32>,
    %12 = vector.extract_strided_slice %3 {offsets = [4, 0], sizes = [9, 20], strides = [1, 1]} : vector<25x20xf32> to vector<9x20xf32>
    %c0_6 = arith.constant 0 : index
    %c80 = arith.constant 80 : index
    %13 = vector.load %arg5[%c0_6, %c80] : memref<9x256xf32, #tpu.memory_space<vmem>>, vector<9x20xf32>
    tpu.vector_store %arg5[%c0_6, %c80], %12 {strides = array<i32>} : memref<9x256xf32, #tpu.memory_space<vmem>>, vector<9x20xf32>,
    %14 = vector.extract_strided_slice %3 {offsets = [5, 0], sizes = [9, 20], strides = [1, 1]} : vector<25x20xf32> to vector<9x20xf32>
    %c0_7 = arith.constant 0 : index
    %c100 = arith.constant 100 : index
    %15 = vector.load %arg5[%c0_7, %c100] : memref<9x256xf32, #tpu.memory_space<vmem>>, vector<9x20xf32>
    tpu.vector_store %arg5[%c0_7, %c100], %14 {strides = array<i32>} : memref<9x256xf32, #tpu.memory_space<vmem>>, vector<9x20xf32>,
    %16 = vector.extract_strided_slice %3 {offsets = [6, 0], sizes = [9, 20], strides = [1, 1]} : vector<25x20xf32> to vector<9x20xf32>
    %c0_8 = arith.constant 0 : index
    %c120 = arith.constant 120 : index
    %17 = vector.load %arg5[%c0_8, %c120] : memref<9x256xf32, #tpu.memory_space<vmem>>, vector<9x20xf32>
    tpu.vector_store %arg5[%c0_8, %c120], %16 {strides = array<i32>} : memref<9x256xf32, #tpu.memory_space<vmem>>, vector<9x20xf32>,
    %18 = vector.extract_strided_slice %3 {offsets = [7, 0], sizes = [9, 20], strides = [1, 1]} : vector<25x20xf32> to vector<9x20xf32>
    %c0_9 = arith.constant 0 : index
    %c140 = arith.constant 140 : index
    %19 = vector.load %arg5[%c0_9, %c140] : memref<9x256xf32, #tpu.memory_space<vmem>>, vector<9x20xf32>
    tpu.vector_store %arg5[%c0_9, %c140], %18 {strides = array<i32>} : memref<9x256xf32, #tpu.memory_space<vmem>>, vector<9x20xf32>,
    %20 = vector.extract_strided_slice %3 {offsets = [8, 0], sizes = [9, 20], strides = [1, 1]} : vector<25x20xf32> to vector<9x20xf32>
    %c0_10 = arith.constant 0 : index
    %c160 = arith.constant 160 : index
    %21 = vector.load %arg5[%c0_10, %c160] : memref<9x256xf32, #tpu.memory_space<vmem>>, vector<9x20xf32>
    tpu.vector_store %arg5[%c0_10, %c160], %20 {strides = array<i32>} : memref<9x256xf32, #tpu.memory_space<vmem>>, vector<9x20xf32>,
    %22 = vector.extract_strided_slice %3 {offsets = [9, 0], sizes = [9, 20], strides = [1, 1]} : vector<25x20xf32> to vector<9x20xf32>
    %c0_11 = arith.constant 0 : index
    %c180 = arith.constant 180 : index
    %23 = vector.load %arg5[%c0_11, %c180] : memref<9x256xf32, #tpu.memory_space<vmem>>, vector<9x20xf32>
    tpu.vector_store %arg5[%c0_11, %c180], %22 {strides = array<i32>} : memref<9x256xf32, #tpu.memory_space<vmem>>, vector<9x20xf32>,
    %c0_12 = arith.constant 0 : index
    %c0_13 = arith.constant 0 : index
    %24 = vector.load %arg5[%c0_12, %c0_13] : memref<9x256xf32, #tpu.memory_space<vmem>>, vector<9x200xf32>
    %c0_14 = arith.constant 0 : index
    %c0_15 = arith.constant 0 : index
    %25 = vector.load %arg3[%c0_14, %c0_15] : memref<200x256xf32, #tpu.memory_space<vmem>>, vector<200x256xf32>
    %cst = arith.constant dense<0.000000e+00> : vector<9x256xf32>
    %26 = tpu.matmul %24, %25, %cst {dimension_numbers = #tpu.dot_dimension_numbers<[1], [0], [0], [1], [0, 0, 1, 1], [], []>} : vector<9x200xf32>, vector<200x256xf32>, vector<9x256xf32> -> vector<9x256xf32>
    %c0_16 = arith.constant 0 : index
    %c0_17 = arith.constant 0 : index
    %c0_18 = arith.constant 0 : index
    %27 = vector.load %arg4[%c0_16, %c0_17, %c0_18] : memref<1x9x256xf32, #tpu.memory_space<vmem>>, vector<1x9x256xf32>
    %28 = vector.shape_cast %27 : vector<1x9x256xf32> to vector<9x256xf32>
    %29 = vector.shape_cast %26 : vector<9x256xf32> to vector<1x9x256xf32>
    tpu.vector_store %arg4[%c0_16, %c0_17, %c0_18], %29 {strides = array<i32>} : memref<1x9x256xf32, #tpu.memory_space<vmem>>, vector<1x9x256xf32>,
    return
  }
  func.func @transform_0(%arg0: i32, %arg1: i32) -> (i32, i32, i32) {
    %c0_i32 = arith.constant 0 : i32
    %c0_i32_0 = arith.constant 0 : i32
    %c0_i32_1 = arith.constant 0 : i32
    return %arg0, %c0_i32, %c0_i32_0 : i32, i32, i32
  }
  func.func @transform_1(%arg0: i32, %arg1: i32) -> (i32, i32) {
    %c0_i32 = arith.constant 0 : i32
    %c0_i32_0 = arith.constant 0 : i32
    %c0_i32_1 = arith.constant 0 : i32
    return %c0_i32, %c0_i32_0 : i32, i32
  }
  func.func @transform_2(%arg0: i32, %arg1: i32) -> (i32, i32, i32) {
    %c0_i32 = arith.constant 0 : i32
    %c0_i32_0 = arith.constant 0 : i32
    return %arg0, %arg1, %c0_i32 : i32, i32, i32
  }
}

module attributes {stable_mosaic.version = 11 : i64} {
  func.func @_dilconv_kernel(%arg0: i32, %arg1: i32, %arg2: memref<4x11x128xf32, #tpu.memory_space<vmem>>, %arg3: memref<3x128x128xf32, #tpu.memory_space<vmem>>, %arg4: memref<4x9x128xf32, #tpu.memory_space<vmem>>, %arg5: memref<1x1x1x128xf32, #tpu.memory_space<vmem>>) attributes {dimension_semantics = [#tpu.dimension_semantics<parallel>, #tpu.dimension_semantics<parallel>], iteration_bounds = array<i64: 1, 2>, scalar_prefetch = 0 : i64, scratch_operands = 0 : i64, tpu.core_type = #tpu.core_type<tc>, window_params = [{transform_indices = @transform_0, window_bounds = array<i64: 4, 11, 128>}, {pipeline_mode = #tpu.pipeline_mode<synchronous>, transform_indices = @transform_1, window_bounds = array<i64: 3, 128, 128>}, {transform_indices = @transform_2, window_bounds = array<i64: 4, 9, 128>}, {transform_indices = @transform_3, window_bounds = array<i64: 1, 1, 1, 128>}]} {
    %c0 = arith.constant 0 : index
    %c0_0 = arith.constant 0 : index
    %c0_1 = arith.constant 0 : index
    %0 = vector.load %arg2[%c0, %c0_0, %c0_1] : memref<4x11x128xf32, #tpu.memory_space<vmem>>, vector<1x11x128xf32>
    %1 = vector.shape_cast %0 : vector<1x11x128xf32> to vector<11x128xf32>
    %cst = arith.constant 0.000000e+00 : f32
    %2 = vector.broadcast %cst : f32 to vector<11x128xf32>
    %3 = arith.cmpf oge, %1, %2 : vector<11x128xf32>
    %cst_2 = arith.constant 0.00999999977 : f32
    %4 = vector.broadcast %cst_2 : f32 to vector<11x128xf32>
    %5 = arith.mulf %4, %1 : vector<11x128xf32>
    %6 = arith.select %3, %1, %5 : vector<11x128xi1>, vector<11x128xf32>
    %7 = vector.extract_strided_slice %6 {offsets = [0, 0], sizes = [9, 128], strides = [1, 1]} : vector<11x128xf32> to vector<9x128xf32>
    %c0_3 = arith.constant 0 : index
    %c0_4 = arith.constant 0 : index
    %c0_5 = arith.constant 0 : index
    %8 = vector.load %arg3[%c0_3, %c0_4, %c0_5] : memref<3x128x128xf32, #tpu.memory_space<vmem>>, vector<1x128x128xf32>
    %9 = vector.shape_cast %8 : vector<1x128x128xf32> to vector<128x128xf32>
    %cst_6 = arith.constant dense<0.000000e+00> : vector<9x128xf32>
    %10 = tpu.matmul %7, %9, %cst_6 {dimension_numbers = #tpu.dot_dimension_numbers<[1], [0], [0], [1], [0, 0, 1, 1], [], []>} : vector<9x128xf32>, vector<128x128xf32>, vector<9x128xf32> -> vector<9x128xf32>
    %11 = vector.extract_strided_slice %6 {offsets = [1, 0], sizes = [9, 128], strides = [1, 1]} : vector<11x128xf32> to vector<9x128xf32>
    %c1 = arith.constant 1 : index
    %c0_7 = arith.constant 0 : index
    %c0_8 = arith.constant 0 : index
    %12 = vector.load %arg3[%c1, %c0_7, %c0_8] : memref<3x128x128xf32, #tpu.memory_space<vmem>>, vector<1x128x128xf32>
    %13 = vector.shape_cast %12 : vector<1x128x128xf32> to vector<128x128xf32>
    %cst_9 = arith.constant dense<0.000000e+00> : vector<9x128xf32>
    %14 = tpu.matmul %11, %13, %cst_9 {dimension_numbers = #tpu.dot_dimension_numbers<[1], [0], [0], [1], [0, 0, 1, 1], [], []>} : vector<9x128xf32>, vector<128x128xf32>, vector<9x128xf32> -> vector<9x128xf32>
    %15 = arith.addf %10, %14 : vector<9x128xf32>
    %16 = vector.extract_strided_slice %6 {offsets = [2, 0], sizes = [9, 128], strides = [1, 1]} : vector<11x128xf32> to vector<9x128xf32>
    %c2 = arith.constant 2 : index
    %c0_10 = arith.constant 0 : index
    %c0_11 = arith.constant 0 : index
    %17 = vector.load %arg3[%c2, %c0_10, %c0_11] : memref<3x128x128xf32, #tpu.memory_space<vmem>>, vector<1x128x128xf32>
    %18 = vector.shape_cast %17 : vector<1x128x128xf32> to vector<128x128xf32>
    %cst_12 = arith.constant dense<0.000000e+00> : vector<9x128xf32>
    %19 = tpu.matmul %16, %18, %cst_12 {dimension_numbers = #tpu.dot_dimension_numbers<[1], [0], [0], [1], [0, 0, 1, 1], [], []>} : vector<9x128xf32>, vector<128x128xf32>, vector<9x128xf32> -> vector<9x128xf32>
    %20 = arith.addf %15, %19 : vector<9x128xf32>
    %c0_13 = arith.constant 0 : index
    %c0_14 = arith.constant 0 : index
    %c0_15 = arith.constant 0 : index
    %21 = vector.load %arg4[%c0_13, %c0_14, %c0_15] : memref<4x9x128xf32, #tpu.memory_space<vmem>>, vector<1x9x128xf32>
    %22 = vector.shape_cast %21 : vector<1x9x128xf32> to vector<9x128xf32>
    %23 = vector.shape_cast %20 : vector<9x128xf32> to vector<1x9x128xf32>
    tpu.vector_store %arg4[%c0_13, %c0_14, %c0_15], %23 {strides = array<i32>} : memref<4x9x128xf32, #tpu.memory_space<vmem>>, vector<1x9x128xf32>,
    %24 = vector.shape_cast %20 : vector<9x128xf32> to vector<1x9x128xf32>
    %cst_16 = arith.constant dense<0.000000e+00> : vector<1xf32>
    %25 = vector.multi_reduction <add>, %24, %cst_16 [1, 2] : vector<1x9x128xf32> to vector<1xf32>
    %26 = vector.shape_cast %25 : vector<1xf32> to vector<1x1x1xf32>
    %27 = vector.extract %26[0, 0, 0] : f32 from vector<1x1x1xf32>
    %cst_17 = arith.constant 0.000000e+00 : f32
    %28 = arith.addf %cst_17, %27 : f32
    %29 = arith.mulf %20, %20 : vector<9x128xf32>
    %30 = vector.shape_cast %29 : vector<9x128xf32> to vector<1x9x128xf32>
    %cst_18 = arith.constant dense<0.000000e+00> : vector<1xf32>
    %31 = vector.multi_reduction <add>, %30, %cst_18 [1, 2] : vector<1x9x128xf32> to vector<1xf32>
    %32 = vector.shape_cast %31 : vector<1xf32> to vector<1x1x1xf32>
    %33 = vector.extract %32[0, 0, 0] : f32 from vector<1x1x1xf32>
    %cst_19 = arith.constant 0.000000e+00 : f32
    %34 = arith.addf %cst_19, %33 : f32
    %c1_20 = arith.constant 1 : index
    %c0_21 = arith.constant 0 : index
    %c0_22 = arith.constant 0 : index
    %35 = vector.load %arg2[%c1_20, %c0_21, %c0_22] : memref<4x11x128xf32, #tpu.memory_space<vmem>>, vector<1x11x128xf32>
    %36 = vector.shape_cast %35 : vector<1x11x128xf32> to vector<11x128xf32>
    %cst_23 = arith.constant 0.000000e+00 : f32
    %37 = vector.broadcast %cst_23 : f32 to vector<11x128xf32>
    %38 = arith.cmpf oge, %36, %37 : vector<11x128xf32>
    %cst_24 = arith.constant 0.00999999977 : f32
    %39 = vector.broadcast %cst_24 : f32 to vector<11x128xf32>
    %40 = arith.mulf %39, %36 : vector<11x128xf32>
    %41 = arith.select %38, %36, %40 : vector<11x128xi1>, vector<11x128xf32>
    %42 = vector.extract_strided_slice %41 {offsets = [0, 0], sizes = [9, 128], strides = [1, 1]} : vector<11x128xf32> to vector<9x128xf32>
    %c0_25 = arith.constant 0 : index
    %c0_26 = arith.constant 0 : index
    %c0_27 = arith.constant 0 : index
    %43 = vector.load %arg3[%c0_25, %c0_26, %c0_27] : memref<3x128x128xf32, #tpu.memory_space<vmem>>, vector<1x128x128xf32>
    %44 = vector.shape_cast %43 : vector<1x128x128xf32> to vector<128x128xf32>
    %cst_28 = arith.constant dense<0.000000e+00> : vector<9x128xf32>
    %45 = tpu.matmul %42, %44, %cst_28 {dimension_numbers = #tpu.dot_dimension_numbers<[1], [0], [0], [1], [0, 0, 1, 1], [], []>} : vector<9x128xf32>, vector<128x128xf32>, vector<9x128xf32> -> vector<9x128xf32>
    %46 = vector.extract_strided_slice %41 {offsets = [1, 0], sizes = [9, 128], strides = [1, 1]} : vector<11x128xf32> to vector<9x128xf32>
    %c1_29 = arith.constant 1 : index
    %c0_30 = arith.constant 0 : index
    %c0_31 = arith.constant 0 : index
    %47 = vector.load %arg3[%c1_29, %c0_30, %c0_31] : memref<3x128x128xf32, #tpu.memory_space<vmem>>, vector<1x128x128xf32>
    %48 = vector.shape_cast %47 : vector<1x128x128xf32> to vector<128x128xf32>
    %cst_32 = arith.constant dense<0.000000e+00> : vector<9x128xf32>
    %49 = tpu.matmul %46, %48, %cst_32 {dimension_numbers = #tpu.dot_dimension_numbers<[1], [0], [0], [1], [0, 0, 1, 1], [], []>} : vector<9x128xf32>, vector<128x128xf32>, vector<9x128xf32> -> vector<9x128xf32>
    %50 = arith.addf %45, %49 : vector<9x128xf32>
    %51 = vector.extract_strided_slice %41 {offsets = [2, 0], sizes = [9, 128], strides = [1, 1]} : vector<11x128xf32> to vector<9x128xf32>
    %c2_33 = arith.constant 2 : index
    %c0_34 = arith.constant 0 : index
    %c0_35 = arith.constant 0 : index
    %52 = vector.load %arg3[%c2_33, %c0_34, %c0_35] : memref<3x128x128xf32, #tpu.memory_space<vmem>>, vector<1x128x128xf32>
    %53 = vector.shape_cast %52 : vector<1x128x128xf32> to vector<128x128xf32>
    %cst_36 = arith.constant dense<0.000000e+00> : vector<9x128xf32>
    %54 = tpu.matmul %51, %53, %cst_36 {dimension_numbers = #tpu.dot_dimension_numbers<[1], [0], [0], [1], [0, 0, 1, 1], [], []>} : vector<9x128xf32>, vector<128x128xf32>, vector<9x128xf32> -> vector<9x128xf32>
    %55 = arith.addf %50, %54 : vector<9x128xf32>
    %c1_37 = arith.constant 1 : index
    %c0_38 = arith.constant 0 : index
    %c0_39 = arith.constant 0 : index
    %56 = vector.load %arg4[%c1_37, %c0_38, %c0_39] : memref<4x9x128xf32, #tpu.memory_space<vmem>>, vector<1x9x128xf32>
    %57 = vector.shape_cast %56 : vector<1x9x128xf32> to vector<9x128xf32>
    %58 = vector.shape_cast %55 : vector<9x128xf32> to vector<1x9x128xf32>
    tpu.vector_store %arg4[%c1_37, %c0_38, %c0_39], %58 {strides = array<i32>} : memref<4x9x128xf32, #tpu.memory_space<vmem>>, vector<1x9x128xf32>,
    %59 = vector.shape_cast %55 : vector<9x128xf32> to vector<1x9x128xf32>
    %cst_40 = arith.constant dense<0.000000e+00> : vector<1xf32>
    %60 = vector.multi_reduction <add>, %59, %cst_40 [1, 2] : vector<1x9x128xf32> to vector<1xf32>
    %61 = vector.shape_cast %60 : vector<1xf32> to vector<1x1x1xf32>
    %62 = vector.extract %61[0, 0, 0] : f32 from vector<1x1x1xf32>
    %63 = arith.addf %28, %62 : f32
    %64 = arith.mulf %55, %55 : vector<9x128xf32>
    %65 = vector.shape_cast %64 : vector<9x128xf32> to vector<1x9x128xf32>
    %cst_41 = arith.constant dense<0.000000e+00> : vector<1xf32>
    %66 = vector.multi_reduction <add>, %65, %cst_41 [1, 2] : vector<1x9x128xf32> to vector<1xf32>
    %67 = vector.shape_cast %66 : vector<1xf32> to vector<1x1x1xf32>
    %68 = vector.extract %67[0, 0, 0] : f32 from vector<1x1x1xf32>
    %69 = arith.addf %34, %68 : f32
    %c2_42 = arith.constant 2 : index
    %c0_43 = arith.constant 0 : index
    %c0_44 = arith.constant 0 : index
    %70 = vector.load %arg2[%c2_42, %c0_43, %c0_44] : memref<4x11x128xf32, #tpu.memory_space<vmem>>, vector<1x11x128xf32>
    %71 = vector.shape_cast %70 : vector<1x11x128xf32> to vector<11x128xf32>
    %cst_45 = arith.constant 0.000000e+00 : f32
    %72 = vector.broadcast %cst_45 : f32 to vector<11x128xf32>
    %73 = arith.cmpf oge, %71, %72 : vector<11x128xf32>
    %cst_46 = arith.constant 0.00999999977 : f32
    %74 = vector.broadcast %cst_46 : f32 to vector<11x128xf32>
    %75 = arith.mulf %74, %71 : vector<11x128xf32>
    %76 = arith.select %73, %71, %75 : vector<11x128xi1>, vector<11x128xf32>
    %77 = vector.extract_strided_slice %76 {offsets = [0, 0], sizes = [9, 128], strides = [1, 1]} : vector<11x128xf32> to vector<9x128xf32>
    %c0_47 = arith.constant 0 : index
    %c0_48 = arith.constant 0 : index
    %c0_49 = arith.constant 0 : index
    %78 = vector.load %arg3[%c0_47, %c0_48, %c0_49] : memref<3x128x128xf32, #tpu.memory_space<vmem>>, vector<1x128x128xf32>
    %79 = vector.shape_cast %78 : vector<1x128x128xf32> to vector<128x128xf32>
    %cst_50 = arith.constant dense<0.000000e+00> : vector<9x128xf32>
    %80 = tpu.matmul %77, %79, %cst_50 {dimension_numbers = #tpu.dot_dimension_numbers<[1], [0], [0], [1], [0, 0, 1, 1], [], []>} : vector<9x128xf32>, vector<128x128xf32>, vector<9x128xf32> -> vector<9x128xf32>
    %81 = vector.extract_strided_slice %76 {offsets = [1, 0], sizes = [9, 128], strides = [1, 1]} : vector<11x128xf32> to vector<9x128xf32>
    %c1_51 = arith.constant 1 : index
    %c0_52 = arith.constant 0 : index
    %c0_53 = arith.constant 0 : index
    %82 = vector.load %arg3[%c1_51, %c0_52, %c0_53] : memref<3x128x128xf32, #tpu.memory_space<vmem>>, vector<1x128x128xf32>
    %83 = vector.shape_cast %82 : vector<1x128x128xf32> to vector<128x128xf32>
    %cst_54 = arith.constant dense<0.000000e+00> : vector<9x128xf32>
    %84 = tpu.matmul %81, %83, %cst_54 {dimension_numbers = #tpu.dot_dimension_numbers<[1], [0], [0], [1], [0, 0, 1, 1], [], []>} : vector<9x128xf32>, vector<128x128xf32>, vector<9x128xf32> -> vector<9x128xf32>
    %85 = arith.addf %80, %84 : vector<9x128xf32>
    %86 = vector.extract_strided_slice %76 {offsets = [2, 0], sizes = [9, 128], strides = [1, 1]} : vector<11x128xf32> to vector<9x128xf32>
    %c2_55 = arith.constant 2 : index
    %c0_56 = arith.constant 0 : index
    %c0_57 = arith.constant 0 : index
    %87 = vector.load %arg3[%c2_55, %c0_56, %c0_57] : memref<3x128x128xf32, #tpu.memory_space<vmem>>, vector<1x128x128xf32>
    %88 = vector.shape_cast %87 : vector<1x128x128xf32> to vector<128x128xf32>
    %cst_58 = arith.constant dense<0.000000e+00> : vector<9x128xf32>
    %89 = tpu.matmul %86, %88, %cst_58 {dimension_numbers = #tpu.dot_dimension_numbers<[1], [0], [0], [1], [0, 0, 1, 1], [], []>} : vector<9x128xf32>, vector<128x128xf32>, vector<9x128xf32> -> vector<9x128xf32>
    %90 = arith.addf %85, %89 : vector<9x128xf32>
    %c2_59 = arith.constant 2 : index
    %c0_60 = arith.constant 0 : index
    %c0_61 = arith.constant 0 : index
    %91 = vector.load %arg4[%c2_59, %c0_60, %c0_61] : memref<4x9x128xf32, #tpu.memory_space<vmem>>, vector<1x9x128xf32>
    %92 = vector.shape_cast %91 : vector<1x9x128xf32> to vector<9x128xf32>
    %93 = vector.shape_cast %90 : vector<9x128xf32> to vector<1x9x128xf32>
    tpu.vector_store %arg4[%c2_59, %c0_60, %c0_61], %93 {strides = array<i32>} : memref<4x9x128xf32, #tpu.memory_space<vmem>>, vector<1x9x128xf32>,
    %94 = vector.shape_cast %90 : vector<9x128xf32> to vector<1x9x128xf32>
    %cst_62 = arith.constant dense<0.000000e+00> : vector<1xf32>
    %95 = vector.multi_reduction <add>, %94, %cst_62 [1, 2] : vector<1x9x128xf32> to vector<1xf32>
    %96 = vector.shape_cast %95 : vector<1xf32> to vector<1x1x1xf32>
    %97 = vector.extract %96[0, 0, 0] : f32 from vector<1x1x1xf32>
    %98 = arith.addf %63, %97 : f32
    %99 = arith.mulf %90, %90 : vector<9x128xf32>
    %100 = vector.shape_cast %99 : vector<9x128xf32> to vector<1x9x128xf32>
    %cst_63 = arith.constant dense<0.000000e+00> : vector<1xf32>
    %101 = vector.multi_reduction <add>, %100, %cst_63 [1, 2] : vector<1x9x128xf32> to vector<1xf32>
    %102 = vector.shape_cast %101 : vector<1xf32> to vector<1x1x1xf32>
    %103 = vector.extract %102[0, 0, 0] : f32 from vector<1x1x1xf32>
    %104 = arith.addf %69, %103 : f32
    %c3 = arith.constant 3 : index
    %c0_64 = arith.constant 0 : index
    %c0_65 = arith.constant 0 : index
    %105 = vector.load %arg2[%c3, %c0_64, %c0_65] : memref<4x11x128xf32, #tpu.memory_space<vmem>>, vector<1x11x128xf32>
    %106 = vector.shape_cast %105 : vector<1x11x128xf32> to vector<11x128xf32>
    %cst_66 = arith.constant 0.000000e+00 : f32
    %107 = vector.broadcast %cst_66 : f32 to vector<11x128xf32>
    %108 = arith.cmpf oge, %106, %107 : vector<11x128xf32>
    %cst_67 = arith.constant 0.00999999977 : f32
    %109 = vector.broadcast %cst_67 : f32 to vector<11x128xf32>
    %110 = arith.mulf %109, %106 : vector<11x128xf32>
    %111 = arith.select %108, %106, %110 : vector<11x128xi1>, vector<11x128xf32>
    %112 = vector.extract_strided_slice %111 {offsets = [0, 0], sizes = [9, 128], strides = [1, 1]} : vector<11x128xf32> to vector<9x128xf32>
    %c0_68 = arith.constant 0 : index
    %c0_69 = arith.constant 0 : index
    %c0_70 = arith.constant 0 : index
    %113 = vector.load %arg3[%c0_68, %c0_69, %c0_70] : memref<3x128x128xf32, #tpu.memory_space<vmem>>, vector<1x128x128xf32>
    %114 = vector.shape_cast %113 : vector<1x128x128xf32> to vector<128x128xf32>
    %cst_71 = arith.constant dense<0.000000e+00> : vector<9x128xf32>
    %115 = tpu.matmul %112, %114, %cst_71 {dimension_numbers = #tpu.dot_dimension_numbers<[1], [0], [0], [1], [0, 0, 1, 1], [], []>} : vector<9x128xf32>, vector<128x128xf32>, vector<9x128xf32> -> vector<9x128xf32>
    %116 = vector.extract_strided_slice %111 {offsets = [1, 0], sizes = [9, 128], strides = [1, 1]} : vector<11x128xf32> to vector<9x128xf32>
    %c1_72 = arith.constant 1 : index
    %c0_73 = arith.constant 0 : index
    %c0_74 = arith.constant 0 : index
    %117 = vector.load %arg3[%c1_72, %c0_73, %c0_74] : memref<3x128x128xf32, #tpu.memory_space<vmem>>, vector<1x128x128xf32>
    %118 = vector.shape_cast %117 : vector<1x128x128xf32> to vector<128x128xf32>
    %cst_75 = arith.constant dense<0.000000e+00> : vector<9x128xf32>
    %119 = tpu.matmul %116, %118, %cst_75 {dimension_numbers = #tpu.dot_dimension_numbers<[1], [0], [0], [1], [0, 0, 1, 1], [], []>} : vector<9x128xf32>, vector<128x128xf32>, vector<9x128xf32> -> vector<9x128xf32>
    %120 = arith.addf %115, %119 : vector<9x128xf32>
    %121 = vector.extract_strided_slice %111 {offsets = [2, 0], sizes = [9, 128], strides = [1, 1]} : vector<11x128xf32> to vector<9x128xf32>
    %c2_76 = arith.constant 2 : index
    %c0_77 = arith.constant 0 : index
    %c0_78 = arith.constant 0 : index
    %122 = vector.load %arg3[%c2_76, %c0_77, %c0_78] : memref<3x128x128xf32, #tpu.memory_space<vmem>>, vector<1x128x128xf32>
    %123 = vector.shape_cast %122 : vector<1x128x128xf32> to vector<128x128xf32>
    %cst_79 = arith.constant dense<0.000000e+00> : vector<9x128xf32>
    %124 = tpu.matmul %121, %123, %cst_79 {dimension_numbers = #tpu.dot_dimension_numbers<[1], [0], [0], [1], [0, 0, 1, 1], [], []>} : vector<9x128xf32>, vector<128x128xf32>, vector<9x128xf32> -> vector<9x128xf32>
    %125 = arith.addf %120, %124 : vector<9x128xf32>
    %c3_80 = arith.constant 3 : index
    %c0_81 = arith.constant 0 : index
    %c0_82 = arith.constant 0 : index
    %126 = vector.load %arg4[%c3_80, %c0_81, %c0_82] : memref<4x9x128xf32, #tpu.memory_space<vmem>>, vector<1x9x128xf32>
    %127 = vector.shape_cast %126 : vector<1x9x128xf32> to vector<9x128xf32>
    %128 = vector.shape_cast %125 : vector<9x128xf32> to vector<1x9x128xf32>
    tpu.vector_store %arg4[%c3_80, %c0_81, %c0_82], %128 {strides = array<i32>} : memref<4x9x128xf32, #tpu.memory_space<vmem>>, vector<1x9x128xf32>,
    %129 = vector.shape_cast %125 : vector<9x128xf32> to vector<1x9x128xf32>
    %cst_83 = arith.constant dense<0.000000e+00> : vector<1xf32>
    %130 = vector.multi_reduction <add>, %129, %cst_83 [1, 2] : vector<1x9x128xf32> to vector<1xf32>
    %131 = vector.shape_cast %130 : vector<1xf32> to vector<1x1x1xf32>
    %132 = vector.extract %131[0, 0, 0] : f32 from vector<1x1x1xf32>
    %133 = arith.addf %98, %132 : f32
    %134 = arith.mulf %125, %125 : vector<9x128xf32>
    %135 = vector.shape_cast %134 : vector<9x128xf32> to vector<1x9x128xf32>
    %cst_84 = arith.constant dense<0.000000e+00> : vector<1xf32>
    %136 = vector.multi_reduction <add>, %135, %cst_84 [1, 2] : vector<1x9x128xf32> to vector<1xf32>
    %137 = vector.shape_cast %136 : vector<1xf32> to vector<1x1x1xf32>
    %138 = vector.extract %137[0, 0, 0] : f32 from vector<1x1x1xf32>
    %139 = arith.addf %104, %138 : f32
    %140 = tpu.iota {dimensions = array<i32: 1>} : vector<1x128xi32>
    %c0_i32 = arith.constant 0 : i32
    %141 = vector.broadcast %c0_i32 : i32 to vector<1x128xi32>
    %142 = arith.cmpi eq, %140, %141 : vector<1x128xi32>
    %c1_i32 = arith.constant 1 : i32
    %143 = vector.broadcast %c1_i32 : i32 to vector<1x128xi32>
    %144 = arith.cmpi eq, %140, %143 : vector<1x128xi32>
    %cst_85 = arith.constant 0.000000e+00 : f32
    %145 = vector.broadcast %139 : f32 to vector<1x128xf32>
    %146 = vector.broadcast %cst_85 : f32 to vector<1x128xf32>
    %147 = arith.select %144, %145, %146 : vector<1x128xi1>, vector<1x128xf32>
    %148 = vector.broadcast %133 : f32 to vector<1x128xf32>
    %149 = arith.select %142, %148, %147 : vector<1x128xi1>, vector<1x128xf32>
    %c0_86 = arith.constant 0 : index
    %c0_87 = arith.constant 0 : index
    %c0_88 = arith.constant 0 : index
    %c0_89 = arith.constant 0 : index
    %150 = vector.load %arg5[%c0_86, %c0_87, %c0_88, %c0_89] : memref<1x1x1x128xf32, #tpu.memory_space<vmem>>, vector<1x1x1x128xf32>
    %151 = vector.shape_cast %150 : vector<1x1x1x128xf32> to vector<1x128xf32>
    %152 = vector.shape_cast %149 : vector<1x128xf32> to vector<1x1x1x128xf32>
    tpu.vector_store %arg5[%c0_86, %c0_87, %c0_88, %c0_89], %152 {strides = array<i32>} : memref<1x1x1x128xf32, #tpu.memory_space<vmem>>, vector<1x1x1x128xf32>,
    return
  }
  func.func @transform_0(%arg0: i32, %arg1: i32) -> (i32, i32, i32) {
    %c0_i32 = arith.constant 0 : i32
    %c0_i32_0 = arith.constant 0 : i32
    return %arg0, %c0_i32, %arg1 : i32, i32, i32
  }
  func.func @transform_1(%arg0: i32, %arg1: i32) -> (i32, i32, i32) {
    %c0_i32 = arith.constant 0 : i32
    %c0_i32_0 = arith.constant 0 : i32
    %c0_i32_1 = arith.constant 0 : i32
    %c0_i32_2 = arith.constant 0 : i32
    return %c0_i32, %c0_i32_0, %c0_i32_1 : i32, i32, i32
  }
  func.func @transform_2(%arg0: i32, %arg1: i32) -> (i32, i32, i32) {
    %c0_i32 = arith.constant 0 : i32
    %c0_i32_0 = arith.constant 0 : i32
    return %arg0, %c0_i32, %arg1 : i32, i32, i32
  }
  func.func @transform_3(%arg0: i32, %arg1: i32) -> (i32, i32, i32, i32) {
    %c0_i32 = arith.constant 0 : i32
    %c0_i32_0 = arith.constant 0 : i32
    %c0_i32_1 = arith.constant 0 : i32
    return %arg0, %arg1, %c0_i32, %c0_i32_0 : i32, i32, i32, i32
  }
}

module attributes {stable_mosaic.version = 11 : i64} {
  func.func @_istft_kernel(%arg0: i32, %arg1: memref<40x256xf32, #tpu.memory_space<vmem>>, %arg2: memref<256x256xf32, #tpu.memory_space<vmem>>, %arg3: memref<1x256xf32, #tpu.memory_space<vmem>>, %arg4: memref<40x256xf32, #tpu.memory_space<vmem>>) attributes {dimension_semantics = [#tpu.dimension_semantics<parallel>], iteration_bounds = array<i64: 1>, scalar_prefetch = 0 : i64, scratch_operands = 0 : i64, tpu.core_type = #tpu.core_type<tc>, window_params = [{transform_indices = @transform_0, window_bounds = array<i64: 40, 256>}, {pipeline_mode = #tpu.pipeline_mode<synchronous>, transform_indices = @transform_1, window_bounds = array<i64: 256, 256>}, {pipeline_mode = #tpu.pipeline_mode<synchronous>, transform_indices = @transform_2, window_bounds = array<i64: 1, 256>}, {transform_indices = @transform_3, window_bounds = array<i64: 40, 256>}]} {
    %c0 = arith.constant 0 : index
    %c0_0 = arith.constant 0 : index
    %0 = vector.load %arg1[%c0, %c0_0] : memref<40x256xf32, #tpu.memory_space<vmem>>, vector<40x256xf32>
    %c0_1 = arith.constant 0 : index
    %c0_2 = arith.constant 0 : index
    %1 = vector.load %arg2[%c0_1, %c0_2] : memref<256x256xf32, #tpu.memory_space<vmem>>, vector<256x256xf32>
    %cst = arith.constant dense<0.000000e+00> : vector<40x256xf32>
    %2 = tpu.matmul %0, %1, %cst {dimension_numbers = #tpu.dot_dimension_numbers<[1], [0], [0], [1], [0, 0, 1, 1], [], []>} : vector<40x256xf32>, vector<256x256xf32>, vector<40x256xf32> -> vector<40x256xf32>
    %c0_3 = arith.constant 0 : index
    %c0_4 = arith.constant 0 : index
    %3 = vector.load %arg3[%c0_3, %c0_4] : memref<1x256xf32, #tpu.memory_space<vmem>>, vector<1x256xf32>
    %4 = vector.broadcast %3 : vector<1x256xf32> to vector<40x256xf32>
    %5 = arith.addf %2, %4 : vector<40x256xf32>
    %c0_5 = arith.constant 0 : index
    %c0_6 = arith.constant 0 : index
    %6 = vector.load %arg4[%c0_5, %c0_6] : memref<40x256xf32, #tpu.memory_space<vmem>>, vector<40x256xf32>
    tpu.vector_store %arg4[%c0_5, %c0_6], %5 {strides = array<i32>} : memref<40x256xf32, #tpu.memory_space<vmem>>, vector<40x256xf32>,
    return
  }
  func.func @transform_0(%arg0: i32) -> (i32, i32) {
    %c0_i32 = arith.constant 0 : i32
    %c0_i32_0 = arith.constant 0 : i32
    return %arg0, %c0_i32 : i32, i32
  }
  func.func @transform_1(%arg0: i32) -> (i32, i32) {
    %c0_i32 = arith.constant 0 : i32
    %c0_i32_0 = arith.constant 0 : i32
    %c0_i32_1 = arith.constant 0 : i32
    return %c0_i32, %c0_i32_0 : i32, i32
  }
  func.func @transform_2(%arg0: i32) -> (i32, i32) {
    %c0_i32 = arith.constant 0 : i32
    %c0_i32_0 = arith.constant 0 : i32
    %c0_i32_1 = arith.constant 0 : i32
    return %c0_i32, %c0_i32_0 : i32, i32
  }
  func.func @transform_3(%arg0: i32) -> (i32, i32) {
    %c0_i32 = arith.constant 0 : i32
    %c0_i32_0 = arith.constant 0 : i32
    return %arg0, %c0_i32 : i32, i32
  }
}

</mosaic_0001>

<bundles_post_ra>
// kernel: stft_att_forward.3
= control target key start
LH: loop header
LB: loop body
LE: loop exit
PB: predicated region body
PF: predicated region fallthrough
CT: control target
= control target key end

     0   :  { %s649_s9 = smov 0   ;;  %s651_s10 = smov 0   ;;  %s881_s0 = inlined_call_operand.vmem [shape: f32[4,25,20], index: 0, kind: input, shape index: {}]   ;;  %s882_s1 = inlined_call_operand.vmem [shape: f32[200,256], index: 1, kind: input, shape index: {}]   ;;  %s883_s2 = inlined_call_operand.vmem [shape: f32[4,9,256], index: 2, kind: output, shape index: {}]  }
   0x1   :  { %s653_s11 = smov 0  }
   0x2 LB: > { %s24_s12 = sadd.s32 1, %s619_s10  ;;  %p555_p0 = scmp.ge.s32.totalorder %s623_s11, 1  ;;  %s623_s11 = sphi %s653_s11, %s12_s11   ;;  %s619_s10 = sphi %s651_s10, %s885_s10   ;;  %s615_s9 = sphi %s649_s9, %s884_s9  }
   0x3   : > { %p26_p1 = scmp.ge.s32.totalorder %s24_s12, 4  ;;  %p126_p2 = scmp.lt.s32.totalorder %s623_s11, 5 }
   0x5   : > { %s887_s12 = smov (%p26_p1, %s24_s12), 0  ;;  %p127_p3 = pnand %p555_p0, %p126_p2 }
   0x6   : > { %p153_p4 = scmp.lt.s32.totalorder (!%p127_p3), %s615_s9, 3  ;;  %s625_s17 = smov (!%p127_p3), 60  }
   0x7   : > { %130 = sbr.rel (%p127_p3) target bundleno = 320 (0x140), region = 28  ;;  %s626_s18 = smov (!%p127_p3), 20  }
   0x8   : > { %s627_s19 = smov (!%p127_p3), 80   ;;  %s628_s20 = smov (!%p127_p3), 120  }
   0x9   : > { %s629_s21 = smov (!%p127_p3), 40   ;;  %s630_s22 = smov (!%p127_p3), 12  }
   0xa   : > { %s631_s7 = smov (!%p127_p3), 32   ;;  %s632_s8 = smov (!%p127_p3), 100  }
   0xb   : > { %s633_s14 = smov (!%p127_p3), 52  }
   0xc   : > { %s889_s9 = smov (!%p153_p4, %s615_s9), 3  ;;  %vm208_vm0 = vcmask 1044480   ;;  %vm180_vm1 = vcmask 1046528   ;;  %vm222_vm2 = vcmask 1043456   ;;  %vm250_vm3 = vcmask 1041408   ;;  %v339_v23 = vld [vmem:[%s882_s1 + $0xf0] sm:$0xff] }
   0xd   : > { %s566_s13 = sshll.u32 %s889_s9, 5  ;;  %vm194_vm4 = vcmask 1045504   ;;  %vm268_vm5 = vcmask 1040384   ;;  %vm236_vm6 = vcmask 1042432   ;;  %v340_v24 = vld [vmem:[%s882_s1 + $0xf8] sm:$0xff]  ;;  %v337_v25 = vld [vmem:[%s882_s1 + $0xe0] sm:$0xff]  ;;  %366 = vmatpush.msra.mxu0 %v339_v23 }
   0xe   : > { %s675_s16 = scalar_lea.vmem %s881_s0, %s566_s13  ;;  %412 = vmatpush.msra.mxu2 %v340_v24  ;;  %v338_v27 = vld [vmem:[%s882_s1 + $0xe8] sm:$0xff]  ;;  %v335_v29 = vld [vmem:[%s882_s1 + $0xd0] sm:$0xff]  ;;  %v336_v30 = vld [vmem:[%s882_s1 + $0xd8] sm:$0xff]  ;;  %vm174_vm7 = vcmask 162816   ;;  %vm176_vm8 = vcmask 155648   ;;  %vm190_vm9 = vcmask 326816  }
   0xf   : > { %v678_v0 = vld [vmem:[%s675_s16] sm:$0xff]  ;;  %v681_v1 = vld [vmem:[%s675_s16 + $0x8] sm:$0xff]  ;;  %v173_v22 = vld [vmem:[%s675_s16 + $0x10] sm:$0xff]  ;;  %367 = vmatpush.msra.mxu0 %v337_v25  ;;  %vm262_vm10 = vcmask 97280   ;;  %vm204_vm11 = vcmask 490816   ;;  %vm218_vm12 = vcmask 654816  }
  0x10   : > { %v209_v2 = vrot.slane %v678_v0, 3  ;;  %v210_v3 = vrot.slane %v681_v1, 3  ;;  %v181_v4 = vrot.slane %v678_v0, 1  ;;  %v182_v5 = vrot.slane %v681_v1, 1  ;;  %413 = vmatpush.msra.mxu2 %v338_v27  ;;  %175 = vst.msk [vmem:[#allocation2] sm:$0xff] %vm174_vm7, %v678_v0  ;;  %v333_v32 = vld [vmem:[%s882_s1 + $0xc0] sm:$0xff] }
  0x11   : > { %v223_v8 = vrot.slane %v678_v0, 4  ;;  %v224_v9 = vrot.slane %v681_v1, 4  ;;  %v251_v10 = vrot.slane %v678_v0, 6  ;;  %v252_v11 = vrot.slane %v681_v1, 6  ;;  %368 = vmatpush.msra.mxu0 %v335_v29  ;;  %v334_v33 = vld [vmem:[%s882_s1 + $0xc8] sm:$0xff]  ;;  %v331_v34 = vld [vmem:[%s882_s1 + $0xb0] sm:$0xff] }
  0x12   : > { %v211_v6 = vsel %vm208_vm0, %v209_v2, %v210_v3  ;;  %v183_v7 = vsel %vm180_vm1, %v181_v4, %v182_v5  ;;  %v195_v12 = vrot.slane %v678_v0, 2  ;;  %v196_v13 = vrot.slane %v681_v1, 2  ;;  %414 = vmatpush.msra.mxu2 %v336_v30  ;;  %v332_v35 = vld [vmem:[%s882_s1 + $0xb8] sm:$0xff]  ;;  %v329_v36 = vld [vmem:[%s882_s1 + $0xa0] sm:$0xff]  ;;  %v330_v37 = vld [vmem:[%s882_s1 + $0xa8] sm:$0xff] }
  0x13   : > { %212 = vrot.lane.b32.xlu1 %v211_v6, %s625_s17  ;;  %184 = vrot.lane.b32.xlu0 %v183_v7, %s626_s18  ;;  %v225_v14 = vsel %vm222_vm2, %v223_v8, %v224_v9  ;;  %v269_v15 = vrot.slane %v678_v0, 7  ;;  %v270_v16 = vrot.slane %v681_v1, 7  ;;  %v253_v17 = vsel %vm250_vm3, %v251_v10, %v252_v11  ;;  %v327_v38 = vld [vmem:[%s882_s1 + $0x90] sm:$0xff]  ;;  %v328_v39 = vld [vmem:[%s882_s1 + $0x98] sm:$0xff]  ;;  %177 = vst.msk [vmem:[#allocation2 + $0x10] sm:$0x1] %vm176_vm8, %v681_v1 }
  0x14   : > { %226 = vrot.lane.b32.xlu2 %v225_v14, %s627_s19  ;;  %v197_v18 = vsel %vm194_vm4, %v195_v12, %v196_v13  ;;  %v237_v20 = vrot.slane %v678_v0, 5  ;;  %v238_v21 = vrot.slane %v681_v1, 5  ;;  %v293_v26 = vrot.slane %v173_v22, 1  ;;  %369 = vmatpush.msra.mxu0 %v333_v32  ;;  %v325_v40 = vld [vmem:[%s882_s1 + $0x80] sm:$0xff]  ;;  %v326_v42 = vld [vmem:[%s882_s1 + $0x88] sm:$0xff]  ;;  %v323_v44 = vld [vmem:[%s882_s1 + $0x70] sm:$0xff] }
  0x15   : > { %v271_v19 = vsel %vm268_vm5, %v269_v15, %v270_v16  ;;  %415 = vmatpush.msra.mxu2 %v334_v33  ;;  %v357_v41 = vld [vmem:[%s882_s1 + $0x180] sm:$0xff]  ;;  %v358_v43 = vld [vmem:[%s882_s1 + $0x188] sm:$0xff]  ;;  %v355_v45 = vld [vmem:[%s882_s1 + $0x170] sm:$0xff]  ;;  %vm278_vm13 = vcmask 261216   ;;  %vm232_vm14 = vcmask 818816   ;;  %vm289_vm15 = vcmask 425216  }
  0x16   : > { %v239_v28 = vsel %vm236_vm6, %v237_v20, %v238_v21  ;;  %v294_v31 = vsel %vm180_vm1, %v182_v5, %v293_v26  ;;  %370 = vmatpush.msra.mxu0 %v331_v34  ;;  %396 = vmatpush.msra.mxu1 %v357_v41  ;;  %v324_v46 = vld [vmem:[%s882_s1 + $0x78] sm:$0xff]  ;;  %v321_v48 = vld [vmem:[%s882_s1 + $0x60] sm:$0xff]  ;;  %v322_v50 = vld [vmem:[%s882_s1 + $0x68] sm:$0xff]  ;;  %vm246_vm0 = vcmask 982816   ;;  %vm260_vm1 = vcmask 1048512  }
  0x17   : > { %416 = vmatpush.msra.mxu2 %v332_v35  ;;  %442 = vmatpush.msra.mxu3 %v358_v43  ;;  %v356_v47 = vld [vmem:[%s882_s1 + $0x178] sm:$0xff]  ;;  %v353_v49 = vld [vmem:[%s882_s1 + $0x160] sm:$0xff]  ;;  %v354_v51 = vld [vmem:[%s882_s1 + $0x168] sm:$0xff]  ;;  %vm301_vm2 = vcmask 589216   ;;  %vm192_vm3 = vcmask 319648   ;;  %vm206_vm4 = vcmask 483648  }
  0x18   : > { %371 = vmatpush.msra.mxu0 %v329_v36  ;;  %397 = vmatpush.msra.mxu1 %v355_v45  ;;  %v319_v52 = vld [vmem:[%s882_s1 + $0x50] sm:$0xff]  ;;  %v320_v54 = vld [vmem:[%s882_s1 + $0x58] sm:$0xff]  ;;  %v317_v56 = vld [vmem:[%s882_s1 + $0x40] sm:$0xff]  ;;  %vm220_vm5 = vcmask 647648   ;;  %vm359_vm6 = vcmask 588800   ;;  %vm234_vm7 = vcmask 811648  }
  0x19   : > { %417 = vmatpush.msra.mxu2 %v330_v37  ;;  %443 = vmatpush.msra.mxu3 %v356_v47  ;;  %v351_v53 = vld [vmem:[%s882_s1 + $0x150] sm:$0xff]  ;;  %v352_v55 = vld [vmem:[%s882_s1 + $0x158] sm:$0xff]  ;;  %v349_v57 = vld [vmem:[%s882_s1 + $0x140] sm:$0xff]  ;;  %vm266_vm8 = vcmask 90112  }
  0x1a   : > { %372 = vmatpush.msra.mxu0 %v327_v38  ;;  %398 = vmatpush.msra.mxu1 %v353_v49  ;;  %v318_v58 = vld [vmem:[%s882_s1 + $0x48] sm:$0xff]  ;;  %v315_v60 = vld [vmem:[%s882_s1 + $0x30] sm:$0xff]  ;;  %v316_v62 = vld [vmem:[%s882_s1 + $0x38] sm:$0xff] }
  0x1b   : > { %254 = vrot.lane.b32.xlu1 %v253_v17, %s628_s20  ;;  %198 = vrot.lane.b32.xlu0 %v197_v18, %s629_s21  ;;  %v350_v59 = vld [vmem:[%s882_s1 + $0x148] sm:$0xff]  ;;  %v347_v61 = vld [vmem:[%s882_s1 + $0x130] sm:$0xff] }
  0x1c   : > { %272 = vrot.lane.b32.xlu2 %v271_v19, %s630_s22  ;;  %418 = vmatpush.msra.mxu2 %v328_v39  ;;  %v348_v63 = vld [vmem:[%s882_s1 + $0x138] sm:$0xff]  ;;  %v313_v0 = vld [vmem:[%s882_s1 + $0x20] sm:$0xff]  ;;  %v346_v4 = vld [vmem:[%s882_s1 + $0x128] sm:$0xff] }
  0x1d   : > { %373 = vmatpush.msra.mxu0 %v325_v40  ;;  %444 = vmatpush.msra.mxu3 %v354_v51  ;;  %v345_v2 = vld [vmem:[%s882_s1 + $0x120] sm:$0xff]  ;;  %v343_v7 = vld [vmem:[%s882_s1 + $0x110] sm:$0xff]  ;;  %v312_v8 = vld [vmem:[%s882_s1 + $0x18] sm:$0xff] }
  0x1e   : > { %419 = vmatpush.msra.mxu2 %v326_v42  ;;  %399 = vmatpush.msra.mxu1 %v351_v53  ;;  %v309_v10 = vld [vmem:[%s882_s1] sm:$0xff]  ;;  %v310_v12 = vld [vmem:[%s882_s1 + $0x8] sm:$0xff] }
  0x1f   : > { %374 = vmatpush.msra.mxu0 %v323_v44  ;;  %445 = vmatpush.msra.mxu3 %v352_v55 }
  0x20   : > { %420 = vmatpush.msra.mxu2 %v324_v46  ;;  %400 = vmatpush.msra.mxu1 %v349_v57 }
  0x21   : > { %375 = vmatpush.msra.mxu0 %v321_v48  ;;  %446 = vmatpush.msra.mxu3 %v350_v59 }
  0x22   : > { %421 = vmatpush.msra.mxu2 %v322_v50  ;;  %401 = vmatpush.msra.mxu1 %v347_v61 }
  0x23   : > { %283 = vrot.lane.b32.xlu1 %v681_v1, %s631_s7  ;;  %240 = vrot.lane.b32.xlu0 %v239_v28, %s632_s8 }
  0x24   : > { %295 = vrot.lane.b32.xlu2 %v294_v31, %s633_s14  ;;  %376 = vmatpush.msra.mxu0 %v319_v52 }
  0x25   : > { %422 = vmatpush.msra.mxu2 %v320_v54  ;;  %447 = vmatpush.msra.mxu3 %v348_v63 }
  0x26   : > { %377 = vmatpush.msra.mxu0 %v317_v56  ;;  %402 = vmatpush.msra.mxu1 %v345_v2 }
  0x27   : > { %423 = vmatpush.msra.mxu2 %v318_v58  ;;  %448 = vmatpush.msra.mxu3 %v346_v4 }
  0x28   : > { %378 = vmatpush.msra.mxu0 %v315_v60  ;;  %403 = vmatpush.msra.mxu1 %v343_v7 }
  0x29   : > { %424 = vmatpush.msra.mxu2 %v316_v62 }
  0x2a   : > { %379 = vmatpush.msra.mxu0 %v313_v0 }
  0x2b   : > { %200 = vrot.lane.b32.xlu1 %v196_v13, %s629_s21  ;;  %186 = vrot.lane.b32.xlu0 %v182_v5, %s626_s18  ;;  %v311_v5 = vld [vmem:[%s882_s1 + $0x10] sm:$0xff]  ;;  %v342_v13 = vld [vmem:[%s882_s1 + $0x108] sm:$0xff] }
  0x2c   : > { %214 = vrot.lane.b32.xlu2 %v210_v3, %s625_s17  ;;  %v314_v3 = vld [vmem:[%s882_s1 + $0x28] sm:$0xff]  ;;  %380 = vmatpush.msra.mxu0 %v311_v5 }
  0x2d   : > { %425 = vmatpush.msra.mxu2 %v314_v3 }
  0x2e   : > { %381 = vmatpush.msra.mxu0 %v309_v10 }
  0x2f   : > { %426 = vmatpush.msra.mxu2 %v312_v8 }
  0x31   : > { %427 = vmatpush.msra.mxu2 %v310_v12 }
  0x33   : > { %228 = vrot.lane.b32.xlu1 %v224_v9, %s627_s19  ;;  %256 = vrot.lane.b32.xlu0 %v252_v11, %s628_s20  ;;  %v344_v9 = vld [vmem:[%s882_s1 + $0x118] sm:$0xff]  ;;  %v341_v11 = vld [vmem:[%s882_s1 + $0x100] sm:$0xff] }
  0x34   : > { %274 = vrot.lane.b32.xlu2 %v270_v16, %s630_s22  ;;  %449 = vmatpush.msra.mxu3 %v344_v9 }
  0x35   : > { %404 = vmatpush.msra.mxu1 %v341_v11 }
  0x36   : > { %450 = vmatpush.msra.mxu3 %v342_v13 }
  0x3b   : > { %285 = vrot.lane.b32.xlu1 %v173_v22, %s631_s7  ;;  %242 = vrot.lane.b32.xlu0 %v238_v21, %s632_s8  ;;  %s167_s8 = scalar_lea.vmem %s883_s2, %s566_s13 }
  0x3c   : > { %297 = vrot.lane.b32.xlu2 %v293_v26, %s633_s14 }
  0x6e   : > { %v227_v6 = vpop.permute.xlu2 %226 }
  0x76   : > { %v273_v15 = vpop.permute.xlu2 %272 }
  0x7e   : > { %v296_v18 = vpop.permute.xlu2 %295 }
  0x85   : > { %v213_v1 = vpop.permute.xlu1 %212  ;;  %v185_v14 = vpop.permute.xlu0 %184 }
  0x86   : > { %191 = vst.msk [vmem:[#allocation2] sm:$0xff] %vm190_vm9, %v185_v14  ;;  %v215_v21 = vpop.permute.xlu2 %214  ;;  %vm280_vm9 = vcmask 254048  }
  0x8d   : > { %v255_v16 = vpop.permute.xlu1 %254  ;;  %v199_v17 = vpop.permute.xlu0 %198 }
  0x8e   : > { %263 = vst.msk [vmem:[#allocation2 + $0x8] sm:$0xff] %vm262_vm10, %v255_v16  ;;  %v275_v26 = vpop.permute.xlu2 %274  ;;  %vm291_vm10 = vcmask 418048  }
  0x8f   : > { %205 = vst.msk [vmem:[#allocation2] sm:$0xff] %vm204_vm11, %v199_v17  ;;  %vm248_vm11 = vcmask 975648  }
  0x90   : > { %219 = vst.msk [vmem:[#allocation2] sm:$0xff] %vm218_vm12, %v213_v1  ;;  %vm264_vm12 = vcmask 1041344  }
  0x91   : > { %279 = vst.msk [vmem:[#allocation2 + $0x8] sm:$0xff] %vm278_vm13, %v273_v15  ;;  %vm303_vm13 = vcmask 582048  }
  0x92   : > { %233 = vst.msk [vmem:[#allocation2] sm:$0xff] %vm232_vm14, %v227_v6 }
  0x95   : > { %v284_v19 = vpop.permute.xlu1 %283  ;;  %v241_v20 = vpop.permute.xlu0 %240 }
  0x96   : > { %290 = vst.msk [vmem:[#allocation2 + $0x8] sm:$0xff] %vm289_vm15, %v284_v19  ;;  %v298_v31 = vpop.permute.xlu2 %297 }
  0x97   : > { %247 = vst.msk [vmem:[#allocation2] sm:$0xff] %vm246_vm0, %v241_v20 }
  0x98   : > { %261 = vst.msk [vmem:[#allocation2] sm:$0xff] %vm260_vm1, %v255_v16 }
  0x99   : > { %302 = vst.msk [vmem:[#allocation2 + $0x8] sm:$0xff] %vm301_vm2, %v296_v18 }
  0x9d   : > { %v201_v22 = vpop.permute.xlu1 %200  ;;  %v187_v23 = vpop.permute.xlu0 %186 }
  0x9e   : > { %193 = vst.msk [vmem:[#allocation2 + $0x10] sm:$0x1] %vm192_vm3, %v187_v23 }
  0x9f   : > { %207 = vst.msk [vmem:[#allocation2 + $0x10] sm:$0x1] %vm206_vm4, %v201_v22  ;;  %v305_v24 = vld [vmem:[#allocation2] sm:$0xff] }
  0xa0   : > { %221 = vst.msk [vmem:[#allocation2 + $0x10] sm:$0x1] %vm220_vm5, %v215_v21  ;;  %382 = vmatmul.f32.vlgmr.msra.gmra.mxu0 %v305_v24  ;;  %v306_v25 = vld [vmem:[#allocation2 + $0x8] sm:$0xff]  ;;  %428 = vmatmul.f32.vlgmr.msra.gmra.mxu2 %v305_v24 }
  0xa1   : > { %560 = vmatmul.msk.f32.vlgmr.msra.gmra.mxu1 %vm359_vm6, %v306_v25  ;;  %562 = vmatmul.msk.f32.vlgmr.msra.gmra.mxu3 %vm359_vm6, %v306_v25 }
  0xa5   : > { %v229_v27 = vpop.permute.xlu1 %228  ;;  %v257_v28 = vpop.permute.xlu0 %256 }
  0xa6   : > { %235 = vst.msk [vmem:[#allocation2 + $0x10] sm:$0x1] %vm234_vm7, %v229_v27 }
  0xa7   : > { %267 = vst.msk [vmem:[#allocation2 + $0x18] sm:$0x1] %vm266_vm8, %v257_v28 }
  0xa8   : > { %281 = vst.msk [vmem:[#allocation2 + $0x18] sm:$0x1] %vm280_vm9, %v275_v26 }
  0xad   : > { %v286_v29 = vpop.permute.xlu1 %285  ;;  %v243_v30 = vpop.permute.xlu0 %242 }
  0xae   : > { %292 = vst.msk [vmem:[#allocation2 + $0x18] sm:$0x1] %vm291_vm10, %v286_v29 }
  0xaf   : > { %249 = vst.msk [vmem:[#allocation2 + $0x10] sm:$0x1] %vm248_vm11, %v243_v30 }
  0xb0   : > { %265 = vst.msk [vmem:[#allocation2 + $0x10] sm:$0x1] %vm264_vm12, %v257_v28 }
  0xb1   : > { %304 = vst.msk [vmem:[#allocation2 + $0x18] sm:$0x1] %vm303_vm13, %v298_v31 }
  0xb7   : > { %v307_v32 = vld [vmem:[#allocation2 + $0x10] sm:$0x1] }
  0xb8   : > { %385 = vmatmul.f32.gmra.mxu0 %v307_v32  ;;  %v308_v33 = vld [vmem:[#allocation2 + $0x18] sm:$0x1]  ;;  %431 = vmatmul.f32.gmra.mxu2 %v307_v32 }
  0xb9   : > { %561 = vmatmul.msk.f32.gmra.mxu1 %vm359_vm6, %v308_v33  ;;  %563 = vmatmul.msk.f32.gmra.mxu3 %vm359_vm6, %v308_v33 }
 0x11d   : > { %v383_v34 = vpop.f32.mrf.mxu0 }
 0x11e   : > { %v406_v35 = vpop.f32.mrf.mxu1 }
 0x11f   : > { %v407_v36 = vadd.f32 %v406_v35, %v383_v34 }
 0x121   : > { %458 = vst [vmem:[%s167_s8] sm:$0xff] %v407_v36 }
 0x123   : > { %v429_v37 = vpop.f32.mrf.mxu2 }
 0x124   : > { %v452_v38 = vpop.f32.mrf.mxu3 }
 0x125   : > { %v453_v39 = vadd.f32 %v452_v38, %v429_v37 }
 0x127   : > { %459 = vst [vmem:[%s167_s8 + $0x8] sm:$0xff] %v453_v39 }
 0x135   : > { %v386_v40 = vpop.f32.mrf.mxu0 }
 0x136   : > { %v409_v41 = vpop.f32.mrf.mxu1 }
 0x137   : > { %v410_v42 = vadd.f32 %v409_v41, %v386_v40 }
 0x139   : > { %460 = vst [vmem:[%s167_s8 + $0x10] sm:$0x1] %v410_v42 }
 0x13b   : > { %v432_v43 = vpop.f32.mrf.mxu2 }
 0x13c   : > { %v455_v44 = vpop.f32.mrf.mxu3 }
 0x13d   : > { %v456_v45 = vadd.f32 %v455_v44, %v432_v43 }
 0x13f   : > { %461 = vst [vmem:[%s167_s8 + $0x18] sm:$0x1] %v456_v45 }
 0x140 PF: > { %s12_s11 = sadd.s32 1, %s623_s11   ;;  %s884_s9 = smov %s619_s10 }
 0x141   : > { %p9_p5 = scmp.ge.s32.totalorder %s12_s11, 6   ;;  %s885_s10 = smov %s887_s12 }
 0x143   :  { %11 = sbr.rel (!%p9_p5) target bundleno = 2 (0x2), region = 59 }

// kernel: stft_att_forward.4
= control target key start
LH: loop header
LB: loop body
LE: loop exit
PB: predicated region body
PF: predicated region fallthrough
CT: control target
= control target key end

     0   :  { %s1408_s12 = smov 0   ;;  %s1410_s13 = smov 0   ;;  %s2004_s0 = inlined_call_operand.vmem [shape: f32[4,11,256], index: 0, kind: input, shape index: {}]   ;;  %s2005_s1 = inlined_call_operand.vmem [shape: f32[3,128,128], index: 1, kind: input, shape index: {}]   ;;  %s2006_s2 = inlined_call_operand.vmem [shape: f32[4,9,256], index: 2, kind: output, shape index: {0}]   ;;  %s2007_s3 = inlined_call_operand.vmem [shape: f32[1,2,1,128], index: 3, kind: output, shape index: {1}]  }
   0x1   :  { %s1412_s14 = smov 0   ;;  %s1414_s15 = smov 0  }
   0x2   :  { %s1416_s16 = smov 0  }
   0x3 LB: > { %s23_s17 = sadd.s32 1, %s1382_s15  ;;  %s1139_s18 = sadd.s32 4294967295, %s1386_s16   ;;  %s1386_s16 = sphi %s1416_s16, %s14_s16   ;;  %s1382_s15 = sphi %s1414_s15, %s2012_s15   ;;  %s1378_s14 = sphi %s1412_s14, %s2011_s14   ;;  %s1374_s13 = sphi %s1410_s13, %s2010_s13   ;;  %s1370_s12 = sphi %s1408_s12, %s2009_s12  }
   0x4   : > { %p24_p0 = scmp.ge.s32.totalorder %s23_s17, 2  ;;  %p42_p1 = scmp.ne.s32.totalorder %s1374_s13, %s1370_s12 }
   0x5   : > { %p43_p2 = scmp.eq.s32.totalorder %s1386_s16, 0  ;;  %p95_p4 = scmp.eq.s32.totalorder %s1139_s18, 1 }
   0x6   : > { %s2014_s17 = smov (%p24_p0, %s23_s17), 0  ;;  %s35_s20 = sadd.s32 1, %s1374_s13 }
   0x7   : > { %p44_p3 = por %p43_p2, %p42_p1  ;;  %s31_s19 = ssub.s32 %s1382_s15, %s2014_s17 }
   0x8   : > { %p33_p5 = scmp.eq.s32.totalorder %s31_s19, 0  ;;  %p1443_p6 = por %p95_p4, %p42_p1 }
   0x9   : > { %p1142_p7 = scmp.ge.s32.totalorder %s1386_s16, 2 }
   0xa   : > { %s1448_s22 = scalar_select %p33_p5, %s1374_s13, %s35_s20  }
   0xb   : > { %148 = sbr.rel (%p1142_p7) target bundleno = 28 (0x1c), region = 20 }
  0x10   : > { %151 = sbr.rel (!%p44_p3) target bundleno = 28 (0x1c), region = 24  ;;  %s153_s23 = sand.u32 (%p44_p3), 1, %s1374_s13  }
  0x11   : > { %s1144_s24 = sshll.u32 (%p44_p3), %s1382_s15, 3  ;;  %s1143_s25 = sshll.u32 (%p44_p3), %s153_s23, 6 }
  0x12   : > { %s160_s28 = scalar_lea.vmem (%p44_p3), %s2004_s0, %s1144_s24  ;;  %s155_s29 = scalar_lea.vmem (%p44_p3), [#allocation2], %s1143_s25 }
  0x13   : > { %v203_v0 = vld [vmem:[%s160_s28] sm:$0xff] (%p44_p3)  ;;  %v205_v1 = vld [vmem:[%s160_s28 + $0x10] sm:$0xff] (%p44_p3) }
  0x14   : > { %v207_v2 = vld [vmem:[%s160_s28 + $0x20] sm:$0xff] (%p44_p3)  ;;  %204 = vst [vmem:[%s155_s29] sm:$0xff] (%p44_p3), %v203_v0  ;;  %v209_v3 = vld [vmem:[%s160_s28 + $0x30] sm:$0xff] (%p44_p3) }
  0x15   : > { %206 = vst [vmem:[%s155_s29 + $0x8] sm:$0xff] %v205_v1  ;;  %v211_v4 = vld [vmem:[%s160_s28 + $0x40] sm:$0xff]  ;;  %v213_v5 = vld [vmem:[%s160_s28 + $0x50] sm:$0xff] }
  0x16   : > { %208 = vst [vmem:[%s155_s29 + $0x10] sm:$0xff] %v207_v2  ;;  %v215_v6 = vld [vmem:[%s160_s28 + $0x60] sm:$0xff]  ;;  %v217_v7 = vld [vmem:[%s160_s28 + $0x70] sm:$0xff] }
  0x17   : > { %210 = vst [vmem:[%s155_s29 + $0x18] sm:$0xff] %v209_v3 }
  0x18   : > { %212 = vst [vmem:[%s155_s29 + $0x20] sm:$0xff] %v211_v4 }
  0x19   : > { %214 = vst [vmem:[%s155_s29 + $0x28] sm:$0xff] %v213_v5 }
  0x1a   : > { %216 = vst [vmem:[%s155_s29 + $0x30] sm:$0xff] %v215_v6 }
  0x1b   : > { %218 = vst [vmem:[%s155_s29 + $0x38] sm:$0xff] %v217_v7 }
  0x1c PF: > { %p1145_p8 = scmp.ge.s32.totalorder %s1386_s16, 1  ;;  %p223_p9 = scmp.lt.s32.totalorder %s1386_s16, 3 }
  0x1e   : > { %p224_p10 = pnand %p1145_p8, %p223_p9 }
  0x1f   : > { %s230_s11 = sand.u32 (!%p224_p10), 1, %s1370_s12   ;;  %p263_p11 = scmp.lt.s32.totalorder (!%p224_p10), %s1378_s14, 1 }
  0x20   : > { %227 = sbr.rel (%p224_p10) target bundleno = 474 (0x1da), region = 62  ;;  %s1624_s27 = sshll.u32 (!%p224_p10), %s230_s11, 6 }
  0x21   : > { %s1684_s26 = scalar_lea.vmem (!%p224_p10), [#allocation2], %s1624_s27 }
  0x25   : > { %v1461_v8 = vld [vmem:[%s2005_s1 + $0xf8] sm:$0xff]  ;;  %v1471_v10 = vld [vmem:[%s2005_s1 + $0xf0] sm:$0xff]  ;;  %v1490_v13 = vld [vmem:[%s2005_s1 + $0xe8] sm:$0xff]  ;;  %vm380_vm2 = vcmask 1045504   ;;  %vm311_vm3 = vcmask 1046528   ;;  %vm413_vm10 = vcmask 1040384  }
  0x26   : > { %v1466_v9 = vld [vmem:[%s2005_s1 + $0x178] sm:$0xff]  ;;  %317 = vmatpush.msra.mxu0 %v1461_v8  ;;  %v1483_v12 = vld [vmem:[%s2005_s1 + $0x170] sm:$0xff]  ;;  %488 = vmatpush.msra.mxu3 %v1461_v8  ;;  %v1500_v15 = vld [vmem:[%s2005_s1 + $0x168] sm:$0xff]  ;;  %s1289_s6 = sshll.u32 (%p1443_p6), %s1378_s14, 3 }
  0x27   : > { %386 = vmatpush.msra.mxu2 %v1466_v9  ;;  %v1478_v11 = vld [vmem:[%s2005_s1 + $0x78] sm:$0xff]  ;;  %v1495_v14 = vld [vmem:[%s2005_s1 + $0x70] sm:$0xff]  ;;  %v1507_v16 = vld [vmem:[%s2005_s1 + $0x68] sm:$0xff] }
  0x28   : > { %340 = vmatpush.msra.mxu1 %v1478_v11  ;;  %318 = vmatpush.msra.mxu0 %v1471_v10  ;;  %v1514_v17 = vld [vmem:[%s2005_s1 + $0xe0] sm:$0xff]  ;;  %v1533_v20 = vld [vmem:[%s2005_s1 + $0xd8] sm:$0xff]  ;;  %v1552_v23 = vld [vmem:[%s2005_s1 + $0xd0] sm:$0xff] }
  0x29   : > { %387 = vmatpush.msra.mxu2 %v1483_v12  ;;  %489 = vmatpush.msra.mxu3 %v1471_v10  ;;  %v1519_v18 = vld [vmem:[%s2005_s1 + $0x160] sm:$0xff]  ;;  %v1538_v21 = vld [vmem:[%s2005_s1 + $0x158] sm:$0xff]  ;;  %v1557_v24 = vld [vmem:[%s2005_s1 + $0x150] sm:$0xff] }
  0x2a   : > { %341 = vmatpush.msra.mxu1 %v1495_v14  ;;  %319 = vmatpush.msra.mxu0 %v1490_v13  ;;  %v1526_v19 = vld [vmem:[%s2005_s1 + $0x60] sm:$0xff]  ;;  %v1545_v22 = vld [vmem:[%s2005_s1 + $0x58] sm:$0xff]  ;;  %v1564_v25 = vld [vmem:[%s2005_s1 + $0x50] sm:$0xff] }
  0x2b   : > { %388 = vmatpush.msra.mxu2 %v1500_v15  ;;  %490 = vmatpush.msra.mxu3 %v1490_v13  ;;  %v1571_v26 = vld [vmem:[%s2005_s1 + $0xc8] sm:$0xff]  ;;  %v1590_v29 = vld [vmem:[%s2005_s1 + $0xc0] sm:$0xff]  ;;  %v1610_v32 = vld [vmem:[%s2005_s1 + $0xb8] sm:$0xff] }
  0x2c   : > { %342 = vmatpush.msra.mxu1 %v1507_v16  ;;  %320 = vmatpush.msra.mxu0 %v1514_v17  ;;  %v1576_v27 = vld [vmem:[%s2005_s1 + $0x148] sm:$0xff]  ;;  %v1595_v30 = vld [vmem:[%s2005_s1 + $0x140] sm:$0xff]  ;;  %v1615_v33 = vld [vmem:[%s2005_s1 + $0x138] sm:$0xff] }
  0x2d   : > { %389 = vmatpush.msra.mxu2 %v1519_v18  ;;  %491 = vmatpush.msra.mxu3 %v1514_v17  ;;  %v1583_v28 = vld [vmem:[%s2005_s1 + $0x48] sm:$0xff]  ;;  %v1603_v31 = vld [vmem:[%s2005_s1 + $0x40] sm:$0xff]  ;;  %v1622_v34 = vld [vmem:[%s2005_s1 + $0x38] sm:$0xff] }
  0x2e   : > { %343 = vmatpush.msra.mxu1 %v1526_v19  ;;  %321 = vmatpush.msra.mxu0 %v1533_v20  ;;  %v1631_v35 = vld [vmem:[%s2005_s1 + $0xb0] sm:$0xff]  ;;  %v1650_v38 = vld [vmem:[%s2005_s1 + $0xa8] sm:$0xff]  ;;  %v1669_v41 = vld [vmem:[%s2005_s1 + $0xa0] sm:$0xff] }
  0x2f   : > { %390 = vmatpush.msra.mxu2 %v1538_v21  ;;  %492 = vmatpush.msra.mxu3 %v1533_v20  ;;  %v1636_v36 = vld [vmem:[%s2005_s1 + $0x130] sm:$0xff]  ;;  %v1655_v39 = vld [vmem:[%s2005_s1 + $0x128] sm:$0xff]  ;;  %v1674_v42 = vld [vmem:[%s2005_s1 + $0x120] sm:$0xff] }
  0x30   : > { %344 = vmatpush.msra.mxu1 %v1545_v22  ;;  %322 = vmatpush.msra.mxu0 %v1552_v23  ;;  %v1643_v37 = vld [vmem:[%s2005_s1 + $0x30] sm:$0xff]  ;;  %v1662_v40 = vld [vmem:[%s2005_s1 + $0x28] sm:$0xff]  ;;  %v1681_v43 = vld [vmem:[%s2005_s1 + $0x20] sm:$0xff] }
  0x31   : > { %391 = vmatpush.msra.mxu2 %v1557_v24  ;;  %493 = vmatpush.msra.mxu3 %v1552_v23  ;;  %v268_v44 = vld [vmem:[%s1684_s26] sm:$0xff]  ;;  %v269_v45 = vld [vmem:[%s1684_s26 + $0x8] sm:$0x7]  ;;  %v1693_v46 = vld [vmem:[%s2005_s1 + $0x98] sm:$0xff] }
  0x32   : > { %345 = vmatpush.msra.mxu1 %v1564_v25  ;;  %323 = vmatpush.msra.mxu0 %v1571_v26  ;;  %v1698_v47 = vld [vmem:[%s2005_s1 + $0x118] sm:$0xff]  ;;  %v1712_v49 = vld [vmem:[%s2005_s1 + $0x90] sm:$0xff]  ;;  %v272_v51 = vmul.f32 0.01, %v268_v44  ;;  %v273_v52 = vmul.f32 0.01, %v269_v45 }
  0x33   : > { %392 = vmatpush.msra.mxu2 %v1576_v27  ;;  %494 = vmatpush.msra.mxu3 %v1571_v26  ;;  %v1705_v48 = vld [vmem:[%s2005_s1 + $0x18] sm:$0xff]  ;;  %v1717_v50 = vld [vmem:[%s2005_s1 + $0x110] sm:$0xff]  ;;  %vm270_vm0 = vcmp.ge.f32.partialorder %v268_v44, 0.0  ;;  %vm271_vm1 = vcmp.ge.f32.partialorder %v269_v45, 0.0  ;;  %v1731_v54 = vld [vmem:[%s2005_s1 + $0x88] sm:$0xff] }
  0x34   : > { %346 = vmatpush.msra.mxu1 %v1583_v28  ;;  %324 = vmatpush.msra.mxu0 %v1590_v29  ;;  %v1724_v53 = vld [vmem:[%s2005_s1 + $0x10] sm:$0xff]  ;;  %v1736_v55 = vld [vmem:[%s2005_s1 + $0x108] sm:$0xff]  ;;  %v1750_v57 = vld [vmem:[%s2005_s1 + $0x80] sm:$0xff]  ;;  %v274_v59 = vsel %vm270_vm0, %v268_v44, %v272_v51  ;;  %v1757_v60 = vsel %vm271_vm1, %v269_v45, %v273_v52 }
  0x35   : > { %393 = vmatpush.msra.mxu2 %v1595_v30  ;;  %495 = vmatpush.msra.mxu3 %v1590_v29  ;;  %v1743_v56 = vld [vmem:[%s2005_s1 + $0x8] sm:$0xff]  ;;  %v1755_v58 = vld [vmem:[%s2005_s1 + $0x100] sm:$0xff]  ;;  %v381_v62 = vrot.slane %v274_v59, 2  ;;  %v382_v63 = vrot.slane %v1757_v60, 2  ;;  %v312_v1 = vrot.slane %v274_v59, 1  ;;  %v313_v2 = vrot.slane %v1757_v60, 1 }
  0x36   : > { %347 = vmatpush.msra.mxu1 %v1603_v31  ;;  %325 = vmatpush.msra.mxu0 %v1610_v32  ;;  %v1766_v61 = vld [vmem:[%s2005_s1] sm:$0xff]  ;;  %v1180_v4 = vld [vmem:[%s1684_s26 + $0x10] sm:$0xff]  ;;  %v1181_v5 = vld [vmem:[%s1684_s26 + $0x18] sm:$0x7] }
  0x37   : > { %394 = vmatpush.msra.mxu2 %v1615_v33  ;;  %496 = vmatpush.msra.mxu3 %v1610_v32  ;;  %v383_v0 = vsel %vm380_vm2, %v381_v62, %v382_v63  ;;  %v314_v3 = vsel %vm311_vm3, %v312_v1, %v313_v2  ;;  %v445_v6 = vmul.f32 0.01, %v1180_v4  ;;  %v446_v7 = vmul.f32 0.01, %v1181_v5 }
  0x38   : > { %348 = vmatpush.msra.mxu1 %v1622_v34  ;;  %326 = vmatpush.msra.mxu0 %v1631_v35  ;;  %vm443_vm4 = vcmp.ge.f32.partialorder %v1180_v4, 0.0  ;;  %vm444_vm5 = vcmp.ge.f32.partialorder %v1181_v5, 0.0 }
  0x39   : > { %395 = vmatpush.msra.mxu2 %v1636_v36  ;;  %497 = vmatpush.msra.mxu3 %v1631_v35  ;;  %v447_v44 = vsel %vm443_vm4, %v1180_v4, %v445_v6  ;;  %v1812_v45 = vsel %vm444_vm5, %v1181_v5, %v446_v7  ;;  %v1216_v4 = vld [vmem:[%s1684_s26 + $0x20] sm:$0xff]  ;;  %v1217_v5 = vld [vmem:[%s1684_s26 + $0x28] sm:$0x7] }
  0x3a   : > { %349 = vmatpush.msra.mxu1 %v1643_v37  ;;  %327 = vmatpush.msra.mxu0 %v1650_v38  ;;  %v483_v51 = vrot.slane %v447_v44, 1  ;;  %v484_v52 = vrot.slane %v1812_v45, 1  ;;  %v551_v62 = vrot.slane %v1812_v45, 2  ;;  %vm612_vm8 = vcmp.ge.f32.partialorder %v1216_v4, 0.0 }
  0x3b   : > { %396 = vmatpush.msra.mxu2 %v1655_v39  ;;  %498 = vmatpush.msra.mxu3 %v1650_v38  ;;  %vm613_vm9 = vcmp.ge.f32.partialorder %v1217_v5, 0.0 }
  0x3c   : > { %350 = vmatpush.msra.mxu1 %v1662_v40  ;;  %328 = vmatpush.msra.mxu0 %v1669_v41 }
  0x3d   : > { %397 = vmatpush.msra.mxu2 %v1674_v42  ;;  %499 = vmatpush.msra.mxu3 %v1669_v41 }
  0x3e   : > { %351 = vmatpush.msra.mxu1 %v1681_v43  ;;  %329 = vmatpush.msra.mxu0 %v1693_v46 }
  0x3f   : > { %398 = vmatpush.msra.mxu2 %v1698_v47  ;;  %500 = vmatpush.msra.mxu3 %v1693_v46 }
  0x40   : > { %352 = vmatpush.msra.mxu1 %v1705_v48  ;;  %330 = vmatpush.msra.mxu0 %v1712_v49 }
  0x41   : > { %399 = vmatpush.msra.mxu2 %v1717_v50  ;;  %501 = vmatpush.msra.mxu3 %v1712_v49 }
  0x42   : > { %353 = vmatpush.msra.mxu1 %v1724_v53  ;;  %331 = vmatpush.msra.mxu0 %v1731_v54 }
  0x43   : > { %400 = vmatpush.msra.mxu2 %v1736_v55  ;;  %502 = vmatpush.msra.mxu3 %v1731_v54 }
  0x44   : > { %354 = vmatpush.msra.mxu1 %v1743_v56  ;;  %332 = vmatpush.msra.mxu0 %v1750_v57 }
  0x45   : > { %401 = vmatpush.msra.mxu2 %v1755_v58  ;;  %503 = vmatpush.msra.mxu3 %v1750_v57 }
  0x46   : > { %511 = vmatpush.msrb.mxu0 %v1478_v11  ;;  %355 = vmatpush.msra.mxu1 %v1766_v61 }
  0x47   : > { %657 = vmatpush.msrb.mxu2 %v1461_v8  ;;  %680 = vmatpush.msrb.mxu3 %v1478_v11 }
  0x48   : > { %512 = vmatpush.msrb.mxu0 %v1495_v14  ;;  %555 = vmatpush.msrb.mxu1 %v1466_v9 }
  0x49   : > { %658 = vmatpush.msrb.mxu2 %v1471_v10  ;;  %681 = vmatpush.msrb.mxu3 %v1495_v14 }
  0x4a   : > { %513 = vmatpush.msrb.mxu0 %v1507_v16  ;;  %556 = vmatpush.msrb.mxu1 %v1483_v12 }
  0x4b   : > { %659 = vmatpush.msrb.mxu2 %v1490_v13  ;;  %682 = vmatpush.msrb.mxu3 %v1507_v16 }
  0x4c   : > { %402 = vmatmul.f32.vlgmr.msra.gmra.mxu2 %v383_v0  ;;  %514 = vmatpush.msrb.mxu0 %v1526_v19  ;;  %v1253_v0 = vld [vmem:[%s1684_s26 + $0x38] sm:$0x7] }
  0x4d   : > { %557 = vmatpush.msrb.mxu1 %v1500_v15  ;;  %660 = vmatpush.msrb.mxu2 %v1514_v17  ;;  %vm782_vm7 = vcmp.ge.f32.partialorder %v1253_v0, 0.0 }
  0x4e   : > { %515 = vmatpush.msrb.mxu0 %v1545_v22  ;;  %683 = vmatpush.msrb.mxu3 %v1526_v19 }
  0x4f   : > { %558 = vmatpush.msrb.mxu1 %v1519_v18  ;;  %661 = vmatpush.msrb.mxu2 %v1533_v20 }
  0x50   : > { %333 = vmatmul.f32.vlgmr.msra.gmra.mxu0 %v314_v3  ;;  %356 = vmatmul.f32.vlgmr.msra.gmra.mxu1 %v274_v59  ;;  %v485_v59 = vsel %vm311_vm3, %v483_v51, %v484_v52  ;;  %v784_v3 = vmul.f32 0.01, %v1253_v0 }
  0x51   : > { %516 = vmatpush.msrb.mxu0 %v1564_v25  ;;  %559 = vmatpush.msrb.mxu1 %v1538_v21 }
  0x52   : > { %662 = vmatpush.msrb.mxu2 %v1552_v23  ;;  %684 = vmatpush.msrb.mxu3 %v1545_v22  ;;  %v1857_v7 = vsel %vm782_vm7, %v1253_v0, %v784_v3 }
  0x53   : > { %517 = vmatpush.msrb.mxu0 %v1583_v28  ;;  %560 = vmatpush.msrb.mxu1 %v1557_v24  ;;  %v889_v51 = vrot.slane %v1857_v7, 2 }
  0x54   : > { %663 = vmatpush.msrb.mxu2 %v1571_v26  ;;  %685 = vmatpush.msrb.mxu3 %v1564_v25 }
  0x55   : > { %405 = vmatmul.f32.gmra.mxu2 %v382_v63  ;;  %518 = vmatpush.msrb.mxu0 %v1603_v31  ;;  %v1252_v63 = vld [vmem:[%s1684_s26 + $0x30] sm:$0xff]  ;;  %s1952_s26 = scalar_lea.vmem [#allocation3], %s1624_s27 }
  0x56   : > { %561 = vmatpush.msrb.mxu1 %v1576_v27  ;;  %664 = vmatpush.msrb.mxu2 %v1590_v29  ;;  %vm781_vm6 = vcmp.ge.f32.partialorder %v1252_v63, 0.0  ;;  %s264_s27 = scalar_select %p263_p11, %s1378_s14, 1 }
  0x57   : > { %686 = vmatpush.msrb.mxu3 %v1583_v28  ;;  %519 = vmatpush.msrb.mxu0 %v1622_v34 }
  0x58   : > { %562 = vmatpush.msrb.mxu1 %v1595_v30  ;;  %665 = vmatpush.msrb.mxu2 %v1610_v32  ;;  %s267_s5 = scalar_lea.vmem %s2007_s3, %s264_s27 }
  0x59   : > { %687 = vmatpush.msrb.mxu3 %v1603_v31  ;;  %336 = vmatmul.f32.gmra.mxu0 %v313_v2  ;;  %v783_v2 = vmul.f32 0.01, %v1252_v63 }
  0x5a   : > { %359 = vmatmul.f32.gmra.mxu1 %v1757_v60  ;;  %520 = vmatpush.msrb.mxu0 %v1643_v37  ;;  %v550_v60 = vrot.slane %v447_v44, 2 }
  0x5b   : > { %563 = vmatpush.msrb.mxu1 %v1615_v33  ;;  %666 = vmatpush.msrb.mxu2 %v1631_v35  ;;  %v1855_v6 = vsel %vm781_vm6, %v1252_v63, %v783_v2 }
  0x5c   : > { %688 = vmatpush.msrb.mxu3 %v1622_v34  ;;  %521 = vmatpush.msrb.mxu0 %v1662_v40  ;;  %v552_v1 = vsel %vm380_vm2, %v550_v60, %v551_v62  ;;  %v821_v60 = vrot.slane %v1855_v6, 1 }
  0x5d   : > { %564 = vmatpush.msrb.mxu1 %v1636_v36  ;;  %667 = vmatpush.msrb.mxu2 %v1650_v38 }
  0x5e   : > { %689 = vmatpush.msrb.mxu3 %v1643_v37  ;;  %522 = vmatpush.msrb.mxu0 %v1681_v43 }
  0x5f   : > { %565 = vmatpush.msrb.mxu1 %v1655_v39  ;;  %668 = vmatpush.msrb.mxu2 %v1669_v41 }
  0x60   : > { %690 = vmatpush.msrb.mxu3 %v1662_v40  ;;  %523 = vmatpush.msrb.mxu0 %v1705_v48 }
  0x61   : > { %566 = vmatpush.msrb.mxu1 %v1674_v42  ;;  %669 = vmatpush.msrb.mxu2 %v1693_v46 }
  0x62   : > { %691 = vmatpush.msrb.mxu3 %v1681_v43  ;;  %524 = vmatpush.msrb.mxu0 %v1724_v53 }
  0x63   : > { %504 = vmatmul.f32.vlgmr.msra.gmra.mxu3 %v485_v59  ;;  %567 = vmatpush.msrb.mxu1 %v1698_v47  ;;  %v615_v59 = vmul.f32 0.01, %v1217_v5 }
  0x64   : > { %670 = vmatpush.msrb.mxu2 %v1712_v49  ;;  %692 = vmatpush.msrb.mxu3 %v1705_v48 }
  0x65   : > { %525 = vmatpush.msrb.mxu0 %v1743_v56  ;;  %568 = vmatpush.msrb.mxu1 %v1717_v50 }
  0x66   : > { %671 = vmatpush.msrb.mxu2 %v1731_v54  ;;  %693 = vmatpush.msrb.mxu3 %v1724_v53 }
  0x67   : > { %526 = vmatpush.msrb.mxu0 %v1766_v61  ;;  %569 = vmatpush.msrb.mxu1 %v1736_v55 }
  0x68   : > { %672 = vmatpush.msrb.mxu2 %v1750_v57  ;;  %694 = vmatpush.msrb.mxu3 %v1743_v56 }
  0x69   : > { %527 = vmatmul.f32.vlgmr.msrb.gmra.mxu0 %v447_v44  ;;  %570 = vmatpush.msrb.mxu1 %v1755_v58  ;;  %v888_v44 = vrot.slane %v1855_v6, 2 }
  0x6a   : > { %724 = vmatpush.msra.mxu0 %v1466_v9  ;;  %849 = vmatpush.msra.mxu2 %v1478_v11  ;;  %v614_v11 = vmul.f32 0.01, %v1216_v4 }
  0x6b   : > { %695 = vmatpush.msrb.mxu3 %v1766_v61  ;;  %571 = vmatmul.f32.vlgmr.msrb.gmra.mxu1 %v552_v1 }
  0x6c   : > { %507 = vmatmul.f32.gmra.mxu3 %v484_v52  ;;  %725 = vmatpush.msra.mxu0 %v1483_v12  ;;  %v1869_v52 = vsel %vm380_vm2, %v888_v44, %v889_v51 }
  0x6d   : > { %850 = vmatpush.msra.mxu2 %v1495_v14  ;;  %893 = vmatpush.msra.mxu3 %v1466_v9  ;;  %v822_v9 = vrot.slane %v1857_v7, 1  ;;  %v1878_v14 = vsel %vm613_vm9, %v1217_v5, %v615_v59 }
  0x6e   : > { %826 = vmatpush.msra.mxu1 %v1461_v8  ;;  %726 = vmatpush.msra.mxu0 %v1500_v15  ;;  %v616_v8 = vsel %vm612_vm8, %v1216_v4, %v614_v11 }
  0x6f   : > { %851 = vmatpush.msra.mxu2 %v1507_v16  ;;  %894 = vmatpush.msra.mxu3 %v1483_v12  ;;  %v1885_v16 = vsel %vm311_vm3, %v821_v60, %v822_v9  ;;  %v653_v12 = vrot.slane %v1878_v14, 1 }
  0x70   : > { %827 = vmatpush.msra.mxu1 %v1471_v10  ;;  %727 = vmatpush.msra.mxu0 %v1519_v18  ;;  %v652_v10 = vrot.slane %v616_v8, 1 }
  0x71   : > { %852 = vmatpush.msra.mxu2 %v1526_v19  ;;  %895 = vmatpush.msra.mxu3 %v1500_v15 }
  0x72   : > { %530 = vmatmul.f32.gmra.mxu0 %v1812_v45  ;;  %828 = vmatpush.msra.mxu1 %v1490_v13  ;;  %v654_v15 = vsel %vm311_vm3, %v652_v10, %v653_v12  ;;  %v719_v13 = vrot.slane %v616_v8, 2 }
  0x73   : > { %728 = vmatpush.msra.mxu0 %v1538_v21  ;;  %853 = vmatpush.msra.mxu2 %v1545_v22 }
  0x74   : > { %896 = vmatpush.msra.mxu3 %v1519_v18  ;;  %574 = vmatmul.f32.gmra.mxu1 %v551_v62 }
  0x75   : > { %729 = vmatpush.msra.mxu0 %v1557_v24  ;;  %854 = vmatpush.msra.mxu2 %v1564_v25 }
  0x76   : > { %897 = vmatpush.msra.mxu3 %v1538_v21  ;;  %829 = vmatpush.msra.mxu1 %v1514_v17  ;;  %v720_v17 = vrot.slane %v1878_v14, 2 }
  0x77   : > { %730 = vmatpush.msra.mxu0 %v1576_v27  ;;  %855 = vmatpush.msra.mxu2 %v1583_v28 }
  0x78   : > { %898 = vmatpush.msra.mxu3 %v1557_v24  ;;  %830 = vmatpush.msra.mxu1 %v1533_v20  ;;  %v721_v18 = vsel %vm380_vm2, %v719_v13, %v720_v17 }
  0x79   : > { %731 = vmatpush.msra.mxu0 %v1595_v30  ;;  %856 = vmatpush.msra.mxu2 %v1603_v31 }
  0x7a   : > { %899 = vmatpush.msra.mxu3 %v1576_v27  ;;  %673 = vmatmul.f32.vlgmr.msrb.gmra.mxu2 %v654_v15 }
  0x7b   : > { %696 = vmatmul.f32.vlgmr.msrb.gmra.mxu3 %v616_v8  ;;  %732 = vmatpush.msra.mxu0 %v1615_v33 }
  0x7c   : > { %831 = vmatpush.msra.mxu1 %v1552_v23  ;;  %857 = vmatpush.msra.mxu2 %v1622_v34 }
  0x7d   : > { %900 = vmatpush.msra.mxu3 %v1595_v30  ;;  %733 = vmatpush.msra.mxu0 %v1636_v36 }
  0x7e   : > { %832 = vmatpush.msra.mxu1 %v1571_v26  ;;  %858 = vmatpush.msra.mxu2 %v1643_v37 }
  0x7f   : > { %901 = vmatpush.msra.mxu3 %v1615_v33  ;;  %734 = vmatpush.msra.mxu0 %v1655_v39 }
  0x80   : > { %833 = vmatpush.msra.mxu1 %v1590_v29  ;;  %859 = vmatpush.msra.mxu2 %v1662_v40 }
  0x81   : > { %902 = vmatpush.msra.mxu3 %v1636_v36  ;;  %735 = vmatpush.msra.mxu0 %v1674_v42 }
  0x82   : > { %834 = vmatpush.msra.mxu1 %v1610_v32  ;;  %860 = vmatpush.msra.mxu2 %v1681_v43 }
  0x83   : > { %903 = vmatpush.msra.mxu3 %v1655_v39  ;;  %676 = vmatmul.f32.gmra.mxu2 %v653_v12 }
  0x84   : > { %699 = vmatmul.f32.gmra.mxu3 %v1878_v14  ;;  %736 = vmatpush.msra.mxu0 %v1698_v47 }
  0x85   : > { %835 = vmatpush.msra.mxu1 %v1631_v35  ;;  %861 = vmatpush.msra.mxu2 %v1705_v48 }
  0x86   : > { %904 = vmatpush.msra.mxu3 %v1674_v42  ;;  %737 = vmatpush.msra.mxu0 %v1717_v50 }
  0x87   : > { %836 = vmatpush.msra.mxu1 %v1650_v38  ;;  %862 = vmatpush.msra.mxu2 %v1724_v53 }
  0x88   : > { %905 = vmatpush.msra.mxu3 %v1698_v47  ;;  %738 = vmatpush.msra.mxu0 %v1736_v55 }
  0x89   : > { %837 = vmatpush.msra.mxu1 %v1669_v41  ;;  %863 = vmatpush.msra.mxu2 %v1743_v56 }
  0x8a   : > { %906 = vmatpush.msra.mxu3 %v1717_v50  ;;  %739 = vmatpush.msra.mxu0 %v1755_v58 }
  0x8b   : > { %838 = vmatpush.msra.mxu1 %v1693_v46  ;;  %864 = vmatpush.msra.mxu2 %v1766_v61 }
  0x8c   : > { %907 = vmatpush.msra.mxu3 %v1736_v55  ;;  %740 = vmatmul.f32.vlgmr.msra.gmra.mxu0 %v721_v18 }
  0x8d   : > { %865 = vmatmul.f32.vlgmr.msra.gmra.mxu2 %v1855_v6  ;;  %839 = vmatpush.msra.mxu1 %v1712_v49 }
  0x8e   : > { %908 = vmatpush.msra.mxu3 %v1755_v58 }
  0x8f   : > { %909 = vmatmul.f32.vlgmr.msra.gmra.mxu3 %v1869_v52  ;;  %840 = vmatpush.msra.mxu1 %v1731_v54 }
  0x91   : > { %841 = vmatpush.msra.mxu1 %v1750_v57 }
  0x92   : > { %842 = vmatmul.f32.vlgmr.msra.gmra.mxu1 %v1885_v16 }
  0x94   : > { %743 = vmatmul.f32.gmra.mxu0 %v720_v17 }
  0x95   : > { %868 = vmatmul.f32.gmra.mxu2 %v1857_v7 }
  0x97   : > { %912 = vmatmul.f32.gmra.mxu3 %v889_v51 }
  0x9a   : > { %845 = vmatmul.f32.gmra.mxu1 %v822_v9 }
  0xcd   : > { %v334_v19 = vpop.f32.mrf.mxu0  ;;  %v357_v20 = vpop.f32.mrf.mxu1 }
  0xce   : > { %v358_v21 = vadd.f32 %v357_v20, %v334_v19 }
  0xcf   : > { %v403_v22 = vpop.f32.mrf.mxu2 }
  0xd0   : > { %v409_v23 = vadd.f32 %v403_v22, %v358_v21 }
  0xd2   : > { %411 = vst [vmem:[%s1952_s26] sm:$0xff] %v409_v23  ;;  %v426_v32 = vmul.f32 %v409_v23, %v409_v23 }
  0xd6   : > { %v337_v24 = vpop.f32.mrf.mxu0 }
  0xd7   : > { %v360_v25 = vpop.f32.mrf.mxu1 }
  0xd8   : > { %v361_v26 = vadd.f32 %v360_v25, %v337_v24  ;;  %v406_v27 = vpop.f32.mrf.mxu2 }
  0xda   : > { %v410_v28 = vadd.f32 %v406_v27, %v361_v26 }
  0xdc   : > { %412 = vst [vmem:[%s1952_s26 + $0x8] sm:$0x1] %v410_v28  ;;  %v414_v29 = vsel %vm413_vm10, %v410_v28, 0.0  ;;  %v427_v30 = vmul.f32 %v410_v28, %v410_v28 }
  0xdd   : > { %v415_v31 = vadd.f32 %v414_v29, %v409_v23 }
  0xde   : > { %v428_v33 = vsel %vm413_vm10, %v427_v30, 0.0 }
  0xdf   : > { %416 = vadd.xlane.f32.xlu0 %v415_v31  ;;  %v429_v34 = vadd.f32 %v428_v33, %v426_v32 }
  0xe6   : > { %v505_v35 = vpop.f32.mrf.mxu3  ;;  %v528_v36 = vpop.f32.mrf.mxu0 }
  0xe7   : > { %v529_v37 = vadd.f32 %v528_v36, %v505_v35  ;;  %430 = vadd.xlane.f32.xlu0 %v429_v34 }
  0xe8   : > { %v572_v38 = vpop.f32.mrf.mxu1 }
  0xe9   : > { %v578_v39 = vadd.f32 %v572_v38, %v529_v37 }
  0xeb   : > { %1214 = vst [vmem:[%s1952_s26 + $0x10] sm:$0xff] %v578_v39  ;;  %v595_v53 = vmul.f32 %v578_v39, %v578_v39 }
  0xef   : > { %v508_v40 = vpop.f32.mrf.mxu3  ;;  %v531_v41 = vpop.f32.mrf.mxu0 }
  0xf0   : > { %v532_v42 = vadd.f32 %v531_v41, %v508_v40 }
  0xf1   : > { %v575_v43 = vpop.f32.mrf.mxu1 }
  0xf2   : > { %v579_v46 = vadd.f32 %v575_v43, %v532_v42 }
  0xf4   : > { %1215 = vst [vmem:[%s1952_s26 + $0x18] sm:$0x1] %v579_v46  ;;  %v583_v47 = vsel %vm413_vm10, %v579_v46, 0.0  ;;  %v596_v49 = vmul.f32 %v579_v46, %v579_v46 }
  0xf5   : > { %v584_v48 = vadd.f32 %v583_v47, %v578_v39 }
  0xf6   : > { %v597_v50 = vsel %vm413_vm10, %v596_v49, 0.0 }
  0xf7   : > { %585 = vadd.xlane.f32.xlu1 %v584_v48  ;;  %v598_v54 = vadd.f32 %v597_v50, %v595_v53 }
  0xfd   : > { %v674_v55 = vpop.f32.mrf.mxu2 }
  0xfe   : > { %v697_v56 = vpop.f32.mrf.mxu3 }
  0xff   : > { %599 = vadd.xlane.f32.xlu1 %v598_v54  ;;  %v698_v58 = vadd.f32 %v697_v56, %v674_v55 }
 0x106   : > { %v677_v57 = vpop.f32.mrf.mxu2 }
 0x107   : > { %v700_v61 = vpop.f32.mrf.mxu3 }
 0x108   : > { %v701_v1 = vadd.f32 %v700_v61, %v677_v57 }
 0x109   : > { %v741_v45 = vpop.f32.mrf.mxu0 }
 0x10a   : > { %v747_v62 = vadd.f32 %v741_v45, %v698_v58 }
 0x10c   : > { %1250 = vst [vmem:[%s1952_s26 + $0x20] sm:$0xff] %v747_v62  ;;  %v764_v14 = vmul.f32 %v747_v62, %v747_v62 }
 0x10f   : > { %v843_v63 = vpop.f32.mrf.mxu1 }
 0x110   : > { %v866_v0 = vpop.f32.mrf.mxu2 }
 0x111   : > { %v867_v2 = vadd.f32 %v866_v0, %v843_v63  ;;  %v744_v3 = vpop.f32.mrf.mxu0 }
 0x112   : > { %v910_v4 = vpop.f32.mrf.mxu3  ;;  %v748_v5 = vadd.f32 %v744_v3, %v701_v1 }
 0x113   : > { %v916_v6 = vadd.f32 %v910_v4, %v867_v2 }
 0x114   : > { %1251 = vst [vmem:[%s1952_s26 + $0x28] sm:$0x1] %v748_v5  ;;  %v752_v7 = vsel %vm413_vm10, %v748_v5, 0.0  ;;  %v765_v51 = vmul.f32 %v748_v5, %v748_v5 }
 0x115   : > { %1286 = vst [vmem:[%s1952_s26 + $0x30] sm:$0xff] %v916_v6  ;;  %v753_v44 = vadd.f32 %v752_v7, %v747_v62  ;;  %v933_v13 = vmul.f32 %v916_v6, %v916_v6 }
 0x116   : > { %v766_v8 = vsel %vm413_vm10, %v765_v51, 0.0 }
 0x117   : > { %v846_v11 = vpop.f32.mrf.mxu1  ;;  %754 = vadd.xlane.f32.xlu2 %v753_v44  ;;  %v767_v12 = vadd.f32 %v766_v8, %v764_v14  ;;  %v947_v14 = vlaneseq }
 0x118   : > { %v869_v59 = vpop.f32.mrf.mxu2 }
 0x119   : > { %v870_v60 = vadd.f32 %v869_v59, %v846_v11 }
 0x11a   : > { %v913_v52 = vpop.f32.mrf.mxu3 }
 0x11b   : > { %v917_v9 = vadd.f32 %v913_v52, %v870_v60 }
 0x11d   : > { %1287 = vst [vmem:[%s1952_s26 + $0x38] sm:$0x1] %v917_v9  ;;  %v921_v16 = vsel %vm413_vm10, %v917_v9, 0.0  ;;  %v934_v10 = vmul.f32 %v917_v9, %v917_v9 }
 0x11e   : > { %v922_v15 = vadd.f32 %v921_v16, %v916_v6  ;;  %v948_v16 = vand.u32 127, %v947_v14 }
 0x11f   : > { %v935_v17 = vsel %vm413_vm10, %v934_v10, 0.0  ;;  %768 = vadd.xlane.f32.xlu2 %v767_v12 }
 0x120   : > { %923 = vadd.xlane.f32.xlu0 %v922_v15  ;;  %v936_v18 = vadd.f32 %v935_v17, %v933_v13  ;;  %vm950_vm11 = vcmp.eq.s32.totalorder %v948_v16, 1  ;;  %vm949_vm12 = vcmp.eq.s32.totalorder %v948_v16, 0  ;;  %v1017_v17 = vld [vmem:[%s1952_s26] sm:$0xff] (%p1443_p6) }
 0x122   : > { %937 = vadd.xlane.f32.xlu1 %v936_v18  ;;  %v1019_v18 = vld [vmem:[%s1952_s26 + $0x8] sm:$0xff] (%p1443_p6) }
 0x152   : > { %v417_v19 = vpop.xlane.xlu0 %416 }
 0x153   : > { %v418_v20 = vrot.slane %v417_v19, 4 }
 0x155   : > { %v419_v21 = vadd.f32 %v418_v20, %v417_v19  ;;  %v1021_v19 = vld [vmem:[%s1952_s26 + $0x10] sm:$0xff] (%p1443_p6)  ;;  %v1023_v20 = vld [vmem:[%s1952_s26 + $0x18] sm:$0xff] (%p1443_p6) }
 0x157   : > { %v420_v22 = vrot.slane %v419_v21, 2 }
 0x159   : > { %v421_v23 = vadd.f32 %v420_v22, %v419_v21  ;;  %v1025_v21 = vld [vmem:[%s1952_s26 + $0x20] sm:$0xff] (%p1443_p6)  ;;  %v1027_v22 = vld [vmem:[%s1952_s26 + $0x28] sm:$0xff] (%p1443_p6) }
 0x15a   : > { %v431_v24 = vpop.xlane.xlu0 %430 }
 0x15b   : > { %v432_v25 = vrot.slane %v431_v24, 4  ;;  %v422_v26 = vrot.slane %v421_v23, 1 }
 0x15d   : > { %v433_v27 = vadd.f32 %v432_v25, %v431_v24  ;;  %v423_v28 = vadd.f32 %v422_v26, %v421_v23  ;;  %v1029_v23 = vld [vmem:[%s1952_s26 + $0x30] sm:$0xff] (%p1443_p6)  ;;  %v1031_v24 = vld [vmem:[%s1952_s26 + $0x38] sm:$0xff] (%p1443_p6) }
 0x15f   : > { %v434_v29 = vrot.slane %v433_v27, 2  ;;  %1292 = vpush %v423_v28 }
 0x161   : > { %v435_v30 = vadd.f32 %v434_v29, %v433_v27 }
 0x163   : > { %v436_v31 = vrot.slane %v435_v30, 1 }
 0x165   : > { %v437_v32 = vadd.f32 %v436_v31, %v435_v30 }
 0x167   : > { %1294 = vpush %v437_v32 }
 0x16a   : > { %v586_v33 = vpop.xlane.xlu1 %585 }
 0x16b   : > { %v587_v34 = vrot.slane %v586_v33, 4 }
 0x16d   : > { %v588_v35 = vadd.f32 %v587_v34, %v586_v33 }
 0x16f   : > { %v589_v36 = vrot.slane %v588_v35, 2 }
 0x171   : > { %v590_v37 = vadd.f32 %v589_v36, %v588_v35 }
 0x172   : > { %v600_v38 = vpop.xlane.xlu1 %599 }
 0x173   : > { %v601_v39 = vrot.slane %v600_v38, 4  ;;  %v591_v40 = vrot.slane %v590_v37, 1 }
 0x175   : > { %v602_v41 = vadd.f32 %v601_v39, %v600_v38  ;;  %v592_v42 = vadd.f32 %v591_v40, %v590_v37 }
 0x177   : > { %v603_v43 = vrot.slane %v602_v41, 2  ;;  %1296 = vpush %v592_v42 }
 0x179   : > { %v604_v46 = vadd.f32 %v603_v43, %v602_v41 }
 0x17b   : > { %v605_v47 = vrot.slane %v604_v46, 1 }
 0x17d   : > { %v606_v48 = vadd.f32 %v605_v47, %v604_v46 }
 0x17f   : > { %1298 = vpush %v606_v48 }
 0x18a   : > { %v755_v49 = vpop.xlane.xlu2 %754 }
 0x18b   : > { %v756_v50 = vrot.slane %v755_v49, 4 }
 0x18d   : > { %v757_v53 = vadd.f32 %v756_v50, %v755_v49 }
 0x18f   : > { %v758_v54 = vrot.slane %v757_v53, 2 }
 0x190   : > { %s1293_s7 = spop %1292 }
 0x191   : > { %v759_v55 = vadd.f32 %v758_v54, %v757_v53 }
 0x192   : > { %v769_v56 = vpop.xlane.xlu2 %768 }
 0x193   : > { %v924_v57 = vpop.xlane.xlu0 %923  ;;  %v770_v58 = vrot.slane %v769_v56, 4  ;;  %v760_v45 = vrot.slane %v759_v55, 1 }
 0x194   : > { %v925_v61 = vrot.slane %v924_v57, 4 }
 0x195   : > { %v938_v62 = vpop.xlane.xlu1 %937  ;;  %v771_v63 = vadd.f32 %v770_v58, %v769_v56  ;;  %v761_v2 = vadd.f32 %v760_v45, %v759_v55 }
 0x196   : > { %v926_v0 = vadd.f32 %v925_v61, %v924_v57  ;;  %v939_v1 = vrot.slane %v938_v62, 4 }
 0x197   : > { %v772_v3 = vrot.slane %v771_v63, 2  ;;  %1300 = vpush %v761_v2 }
 0x198   : > { %v927_v4 = vrot.slane %v926_v0, 2  ;;  %v940_v5 = vadd.f32 %v939_v1, %v938_v62  ;;  %s1295_s8 = spop %1294 }
 0x199   : > { %v773_v6 = vadd.f32 %v772_v3, %v771_v63 }
 0x19a   : > { %v928_v7 = vadd.f32 %v927_v4, %v926_v0  ;;  %v941_v44 = vrot.slane %v940_v5, 2 }
 0x19b   : > { %v774_v11 = vrot.slane %v773_v6, 1 }
 0x19c   : > { %v942_v51 = vadd.f32 %v941_v44, %v940_v5  ;;  %v929_v59 = vrot.slane %v928_v7, 1 }
 0x19d   : > { %v775_v60 = vadd.f32 %v774_v11, %v773_v6 }
 0x19e   : > { %v930_v52 = vadd.f32 %v929_v59, %v928_v7  ;;  %v943_v9 = vrot.slane %v942_v51, 1 }
 0x19f   : > { %1302 = vpush %v775_v60 }
 0x1a0   : > { %v944_v8 = vadd.f32 %v943_v9, %v942_v51  ;;  %1304 = vpush %v930_v52 }
 0x1a2   : > { %1306 = vpush %v944_v8 }
 0x1a8   : > { %s1297_s9 = spop %1296 }
 0x1a9   : > { %s594_s18 = sadd.f32 %s1297_s9, %s1293_s7 }
 0x1b0   : > { %s1299_s10 = spop %1298 }
 0x1b1   : > { %s608_s19 = sadd.f32 %s1299_s10, %s1295_s8  ;;  %s974_s8 = scalar_lea.vmem (%p1443_p6), %s2006_s2, %s1289_s6 }
 0x1b2   : > { %1018 = vst [vmem:[%s974_s8] sm:$0xff] (%p1443_p6), %v1017_v17 }
 0x1b3   : > { %1020 = vst [vmem:[%s974_s8 + $0x10] sm:$0xff] (%p1443_p6), %v1019_v18 }
 0x1b4   : > { %1022 = vst [vmem:[%s974_s8 + $0x20] sm:$0xff] (%p1443_p6), %v1021_v19 }
 0x1b5   : > { %1024 = vst [vmem:[%s974_s8 + $0x30] sm:$0xff] (%p1443_p6), %v1023_v20 }
 0x1b6   : > { %1026 = vst [vmem:[%s974_s8 + $0x40] sm:$0xff] (%p1443_p6), %v1025_v21 }
 0x1b7   : > { %1028 = vst [vmem:[%s974_s8 + $0x50] sm:$0xff] (%p1443_p6), %v1027_v22 }
 0x1b8   : > { %1030 = vst [vmem:[%s974_s8 + $0x60] sm:$0xff] (%p1443_p6), %v1029_v23 }
 0x1b9   : > { %1032 = vst [vmem:[%s974_s8 + $0x70] sm:$0xff] (%p1443_p6), %v1031_v24 }
 0x1c8   : > { %s1301_s11 = spop %1300 }
 0x1c9   : > { %s763_s20 = sadd.f32 %s1301_s11, %s594_s18 }
 0x1d0   : > { %s1303_s23 = spop %1302 }
 0x1d1   : > { %s777_s24 = sadd.f32 %s1303_s23, %s608_s19  ;;  %s1305_s12 = spop %1304 }
 0x1d2   : > { %s932_s25 = sadd.f32 %s1305_s12, %s763_s20 }
 0x1d3   : > { %s1307_s28 = spop %1306 }
 0x1d4   : > { %s946_s29 = sadd.f32 %s1307_s28, %s777_s24  ;;  %v953_v12 = vstv %s932_s25 }
 0x1d5   : > { %969 = sbr.rel (!%p1443_p6) target bundleno = 474 (0x1da), region = 70 }
 0x1d6   : > { %v951_v10 = vstv %s946_s29 }
 0x1d7   : > { %v952_v15 = vsel %vm950_vm11, %v951_v10, 0.0 }
 0x1d8   : > { %v954_v13 = vsel %vm949_vm12, %v953_v12, %v952_v15 }
 0x1d9   : > { %955 = vst [vmem:[%s267_s5] sm:$0x1] %v954_v13 }
 0x1da PF: > { %s14_s16 = sadd.s32 1, %s1386_s16   ;;  %s2009_s12 = smov %s1374_s13 }
 0x1db   : > { %p11_p12 = scmp.ge.s32.totalorder %s14_s16, 4   ;;  %s2010_s13 = smov %s1448_s22 }
 0x1dc   : > { %s2011_s14 = smov %s1382_s15  ;;  %s2012_s15 = smov %s2014_s17 }
 0x1dd   :  { %13 = sbr.rel (!%p11_p12) target bundleno = 3 (0x3), region = 159 }

// kernel: stft_att_forward.5
= control target key start
LH: loop header
LB: loop body
LE: loop exit
PB: predicated region body
PF: predicated region fallthrough
CT: control target
= control target key end

     0   :  { %s511_s1 = inlined_call_operand.vmem [shape: f32[256,256], index: 1, kind: input, shape index: {}]   ;;  %s512_s0 = inlined_call_operand.vmem [shape: f32[40,256], index: 0, kind: input, shape index: {}]   ;;  %s513_s2 = inlined_call_operand.vmem [shape: f32[1,256], index: 2, kind: input, shape index: {}]   ;;  %s514_s3 = inlined_call_operand.vmem [shape: f32[40,256], index: 3, kind: output, shape index: {}]  }
   0x1   :  { %v55_v0 = vld [vmem:[%s511_s1 + $0xf8] sm:$0xff]  ;;  %v53_v1 = vld [vmem:[%s511_s1 + $0xe8] sm:$0xff]  ;;  %v54_v4 = vld [vmem:[%s511_s1 + $0xf0] sm:$0xff] }
   0x2   :  { %v87_v2 = vld [vmem:[%s511_s1 + $0x1f8] sm:$0xff]  ;;  %158 = vmatpush.msra.mxu2 %v55_v0  ;;  %v85_v3 = vld [vmem:[%s511_s1 + $0x1e8] sm:$0xff]  ;;  %94 = vmatpush.msra.mxu0 %v54_v4  ;;  %v52_v7 = vld [vmem:[%s511_s1 + $0xe0] sm:$0xff] }
   0x3   :  { %190 = vmatpush.msra.mxu3 %v87_v2  ;;  %v51_v5 = vld [vmem:[%s511_s1 + $0xd8] sm:$0xff]  ;;  %v49_v8 = vld [vmem:[%s511_s1 + $0xc8] sm:$0xff]  ;;  %v86_v9 = vld [vmem:[%s511_s1 + $0x1f0] sm:$0xff] }
   0x4   :  { %v83_v6 = vld [vmem:[%s511_s1 + $0x1d8] sm:$0xff]  ;;  %159 = vmatpush.msra.mxu2 %v53_v1  ;;  %95 = vmatpush.msra.mxu0 %v52_v7  ;;  %v81_v10 = vld [vmem:[%s511_s1 + $0x1c8] sm:$0xff]  ;;  %v50_v11 = vld [vmem:[%s511_s1 + $0xd0] sm:$0xff] }
   0x5   :  { %191 = vmatpush.msra.mxu3 %v85_v3  ;;  %126 = vmatpush.msra.mxu1 %v86_v9  ;;  %v84_v12 = vld [vmem:[%s511_s1 + $0x1e0] sm:$0xff]  ;;  %v82_v14 = vld [vmem:[%s511_s1 + $0x1d0] sm:$0xff]  ;;  %v47_v15 = vld [vmem:[%s511_s1 + $0xb8] sm:$0xff] }
   0x6   :  { %160 = vmatpush.msra.mxu2 %v51_v5  ;;  %v48_v13 = vld [vmem:[%s511_s1 + $0xc0] sm:$0xff]  ;;  %96 = vmatpush.msra.mxu0 %v50_v11  ;;  %v79_v16 = vld [vmem:[%s511_s1 + $0x1b8] sm:$0xff]  ;;  %v46_v17 = vld [vmem:[%s511_s1 + $0xb0] sm:$0xff] }
   0x7   :  { %192 = vmatpush.msra.mxu3 %v83_v6  ;;  %127 = vmatpush.msra.mxu1 %v84_v12  ;;  %v80_v18 = vld [vmem:[%s511_s1 + $0x1c0] sm:$0xff]  ;;  %v45_v19 = vld [vmem:[%s511_s1 + $0xa8] sm:$0xff]  ;;  %v78_v22 = vld [vmem:[%s511_s1 + $0x1b0] sm:$0xff] }
   0x8   :  { %161 = vmatpush.msra.mxu2 %v49_v8  ;;  %97 = vmatpush.msra.mxu0 %v48_v13  ;;  %v77_v20 = vld [vmem:[%s511_s1 + $0x1a8] sm:$0xff]  ;;  %v44_v21 = vld [vmem:[%s511_s1 + $0xa0] sm:$0xff]  ;;  %v43_v23 = vld [vmem:[%s511_s1 + $0x98] sm:$0xff] }
   0x9   :  { %193 = vmatpush.msra.mxu3 %v81_v10  ;;  %128 = vmatpush.msra.mxu1 %v82_v14  ;;  %v75_v24 = vld [vmem:[%s511_s1 + $0x198] sm:$0xff]  ;;  %v42_v25 = vld [vmem:[%s511_s1 + $0x90] sm:$0xff]  ;;  %v76_v26 = vld [vmem:[%s511_s1 + $0x1a0] sm:$0xff] }
   0xa   :  { %162 = vmatpush.msra.mxu2 %v47_v15  ;;  %98 = vmatpush.msra.mxu0 %v46_v17  ;;  %v41_v27 = vld [vmem:[%s511_s1 + $0x88] sm:$0xff]  ;;  %v40_v29 = vld [vmem:[%s511_s1 + $0x80] sm:$0xff]  ;;  %v74_v30 = vld [vmem:[%s511_s1 + $0x190] sm:$0xff] }
   0xb   :  { %194 = vmatpush.msra.mxu3 %v79_v16  ;;  %129 = vmatpush.msra.mxu1 %v80_v18  ;;  %v73_v28 = vld [vmem:[%s511_s1 + $0x188] sm:$0xff]  ;;  %v39_v31 = vld [vmem:[%s511_s1 + $0x78] sm:$0xff]  ;;  %v38_v33 = vld [vmem:[%s511_s1 + $0x70] sm:$0xff] }
   0xc   :  { %163 = vmatpush.msra.mxu2 %v45_v19  ;;  %99 = vmatpush.msra.mxu0 %v44_v21  ;;  %v71_v32 = vld [vmem:[%s511_s1 + $0x178] sm:$0xff]  ;;  %v72_v34 = vld [vmem:[%s511_s1 + $0x180] sm:$0xff]  ;;  %v37_v35 = vld [vmem:[%s511_s1 + $0x68] sm:$0xff] }
   0xd   :  { %195 = vmatpush.msra.mxu3 %v77_v20  ;;  %130 = vmatpush.msra.mxu1 %v78_v22  ;;  %v69_v36 = vld [vmem:[%s511_s1 + $0x168] sm:$0xff]  ;;  %v36_v37 = vld [vmem:[%s511_s1 + $0x60] sm:$0xff]  ;;  %v70_v38 = vld [vmem:[%s511_s1 + $0x170] sm:$0xff] }
   0xe   :  { %164 = vmatpush.msra.mxu2 %v43_v23  ;;  %100 = vmatpush.msra.mxu0 %v42_v25  ;;  %v35_v39 = vld [vmem:[%s511_s1 + $0x58] sm:$0xff]  ;;  %v34_v41 = vld [vmem:[%s511_s1 + $0x50] sm:$0xff]  ;;  %v68_v42 = vld [vmem:[%s511_s1 + $0x160] sm:$0xff] }
   0xf   :  { %196 = vmatpush.msra.mxu3 %v75_v24  ;;  %131 = vmatpush.msra.mxu1 %v76_v26  ;;  %v67_v40 = vld [vmem:[%s511_s1 + $0x158] sm:$0xff]  ;;  %v33_v43 = vld [vmem:[%s511_s1 + $0x48] sm:$0xff]  ;;  %v32_v45 = vld [vmem:[%s511_s1 + $0x40] sm:$0xff] }
  0x10   :  { %165 = vmatpush.msra.mxu2 %v41_v27  ;;  %101 = vmatpush.msra.mxu0 %v40_v29  ;;  %v65_v44 = vld [vmem:[%s511_s1 + $0x148] sm:$0xff]  ;;  %v66_v46 = vld [vmem:[%s511_s1 + $0x150] sm:$0xff]  ;;  %v31_v47 = vld [vmem:[%s511_s1 + $0x38] sm:$0xff] }
  0x11   :  { %197 = vmatpush.msra.mxu3 %v73_v28  ;;  %132 = vmatpush.msra.mxu1 %v74_v30  ;;  %v63_v48 = vld [vmem:[%s511_s1 + $0x138] sm:$0xff]  ;;  %v30_v49 = vld [vmem:[%s511_s1 + $0x30] sm:$0xff]  ;;  %v64_v50 = vld [vmem:[%s511_s1 + $0x140] sm:$0xff] }
  0x12   :  { %166 = vmatpush.msra.mxu2 %v39_v31  ;;  %102 = vmatpush.msra.mxu0 %v38_v33  ;;  %v29_v51 = vld [vmem:[%s511_s1 + $0x28] sm:$0xff]  ;;  %v28_v53 = vld [vmem:[%s511_s1 + $0x20] sm:$0xff]  ;;  %v62_v54 = vld [vmem:[%s511_s1 + $0x130] sm:$0xff] }
  0x13   :  { %198 = vmatpush.msra.mxu3 %v71_v32  ;;  %133 = vmatpush.msra.mxu1 %v72_v34  ;;  %v61_v52 = vld [vmem:[%s511_s1 + $0x128] sm:$0xff]  ;;  %v27_v55 = vld [vmem:[%s511_s1 + $0x18] sm:$0xff]  ;;  %v26_v57 = vld [vmem:[%s511_s1 + $0x10] sm:$0xff] }
  0x14   :  { %167 = vmatpush.msra.mxu2 %v37_v35  ;;  %103 = vmatpush.msra.mxu0 %v36_v37  ;;  %v59_v56 = vld [vmem:[%s511_s1 + $0x118] sm:$0xff]  ;;  %v60_v58 = vld [vmem:[%s511_s1 + $0x120] sm:$0xff]  ;;  %v25_v59 = vld [vmem:[%s511_s1 + $0x8] sm:$0xff] }
  0x15   :  { %199 = vmatpush.msra.mxu3 %v69_v36  ;;  %134 = vmatpush.msra.mxu1 %v70_v38  ;;  %v57_v60 = vld [vmem:[%s511_s1 + $0x108] sm:$0xff]  ;;  %v14_v61 = vld [vmem:[%s512_s0] sm:$0xff]  ;;  %v58_v0 = vld [vmem:[%s511_s1 + $0x110] sm:$0xff] }
  0x16   :  { %168 = vmatpush.msra.mxu2 %v35_v39  ;;  %104 = vmatpush.msra.mxu0 %v34_v41  ;;  %v15_v62 = vld [vmem:[%s512_s0 + $0x8] sm:$0xff]  ;;  %v24_v63 = vld [vmem:[%s511_s1] sm:$0xff]  ;;  %v16_v2 = vld [vmem:[%s512_s0 + $0x10] sm:$0xff] }
  0x17   :  { %200 = vmatpush.msra.mxu3 %v67_v40  ;;  %135 = vmatpush.msra.mxu1 %v68_v42  ;;  %v56_v1 = vld [vmem:[%s511_s1 + $0x100] sm:$0xff]  ;;  %v17_v3 = vld [vmem:[%s512_s0 + $0x18] sm:$0xff]  ;;  %v19_v5 = vld [vmem:[%s512_s0 + $0x28] sm:$0xff] }
  0x18   :  { %169 = vmatpush.msra.mxu2 %v33_v43  ;;  %105 = vmatpush.msra.mxu0 %v32_v45  ;;  %v18_v4 = vld [vmem:[%s512_s0 + $0x20] sm:$0xff]  ;;  %v20_v6 = vld [vmem:[%s512_s0 + $0x30] sm:$0xff]  ;;  %v21_v7 = vld [vmem:[%s512_s0 + $0x38] sm:$0xff] }
  0x19   :  { %201 = vmatpush.msra.mxu3 %v65_v44  ;;  %136 = vmatpush.msra.mxu1 %v66_v46  ;;  %v22_v8 = vld [vmem:[%s512_s0 + $0x40] sm:$0xff]  ;;  %v23_v9 = vld [vmem:[%s512_s0 + $0x48] sm:$0xff] }
  0x1a   :  { %170 = vmatpush.msra.mxu2 %v31_v47  ;;  %106 = vmatpush.msra.mxu0 %v30_v49  ;;  %v88_v10 = vld [vmem:[%s513_s2] sm:$0x3] }
  0x1b   :  { %202 = vmatpush.msra.mxu3 %v63_v48  ;;  %137 = vmatpush.msra.mxu1 %v64_v50  ;;  %v90_v11 = vperm.slane %v88_v10, 0  ;;  %v91_v14 = vperm.slane %v88_v10, 1 }
  0x1c   :  { %171 = vmatpush.msra.mxu2 %v29_v51  ;;  %107 = vmatpush.msra.mxu0 %v28_v53 }
  0x1d   :  { %203 = vmatpush.msra.mxu3 %v61_v52  ;;  %138 = vmatpush.msra.mxu1 %v62_v54 }
  0x1e   :  { %172 = vmatpush.msra.mxu2 %v27_v55  ;;  %108 = vmatpush.msra.mxu0 %v26_v57 }
  0x1f   :  { %204 = vmatpush.msra.mxu3 %v59_v56  ;;  %139 = vmatpush.msra.mxu1 %v60_v58 }
  0x20   :  { %173 = vmatpush.msra.mxu2 %v25_v59  ;;  %109 = vmatpush.msra.mxu0 %v24_v63 }
  0x21   :  { %205 = vmatpush.msra.mxu3 %v57_v60  ;;  %174 = vmatmul.f32.vlgmr.msra.gmra.mxu2 %v14_v61 }
  0x22   :  { %206 = vmatmul.f32.vlgmr.msra.gmra.mxu3 %v15_v62  ;;  %140 = vmatpush.msra.mxu1 %v58_v0 }
  0x23   :  { %110 = vmatmul.f32.vlgmr.msra.gmra.mxu0 %v14_v61 }
  0x24   :  { %141 = vmatpush.msra.mxu1 %v56_v1 }
  0x25   :  { %142 = vmatmul.f32.vlgmr.msra.gmra.mxu1 %v15_v62 }
  0x29   :  { %177 = vmatmul.f32.gmra.mxu2 %v16_v2 }
  0x2a   :  { %209 = vmatmul.f32.gmra.mxu3 %v17_v3 }
  0x2b   :  { %113 = vmatmul.f32.gmra.mxu0 %v16_v2 }
  0x2d   :  { %145 = vmatmul.f32.gmra.mxu1 %v17_v3 }
  0x31   :  { %180 = vmatmul.f32.gmra.mxu2 %v18_v4 }
  0x32   :  { %212 = vmatmul.f32.gmra.mxu3 %v19_v5 }
  0x33   :  { %116 = vmatmul.f32.gmra.mxu0 %v18_v4 }
  0x35   :  { %148 = vmatmul.f32.gmra.mxu1 %v19_v5 }
  0x39   :  { %183 = vmatmul.f32.gmra.mxu2 %v20_v6 }
  0x3a   :  { %215 = vmatmul.f32.gmra.mxu3 %v21_v7 }
  0x3b   :  { %119 = vmatmul.f32.gmra.mxu0 %v20_v6 }
  0x3d   :  { %151 = vmatmul.f32.gmra.mxu1 %v21_v7 }
  0x41   :  { %186 = vmatmul.f32.gmra.mxu2 %v22_v8 }
  0x42   :  { %218 = vmatmul.f32.gmra.mxu3 %v23_v9 }
  0x43   :  { %122 = vmatmul.f32.gmra.mxu0 %v22_v8 }
  0x45   :  { %154 = vmatmul.f32.gmra.mxu1 %v23_v9 }
  0xa0   :  { %v111_v12 = vpop.f32.mrf.mxu0 }
  0xa1   :  { %v112_v13 = vadd.f32 %v111_v12, %v90_v11 }
  0xa2   :  { %v143_v15 = vpop.f32.mrf.mxu1 }
  0xa3   :  { %v144_v16 = vadd.f32 %v143_v15, %v112_v13 }
  0xa4   :  { %v175_v17 = vpop.f32.mrf.mxu2 }
  0xa5   :  { %v207_v18 = vpop.f32.mrf.mxu3  ;;  %v176_v19 = vadd.f32 %v175_v17, %v91_v14  ;;  %222 = vst [vmem:[%s514_s3] sm:$0xff] %v144_v16 }
  0xa7   :  { %v208_v20 = vadd.f32 %v207_v18, %v176_v19 }
  0xa8   :  { %v114_v21 = vpop.f32.mrf.mxu0 }
  0xa9   :  { %223 = vst [vmem:[%s514_s3 + $0x8] sm:$0xff] %v208_v20  ;;  %v115_v22 = vadd.f32 %v114_v21, %v90_v11 }
  0xaa   :  { %v146_v23 = vpop.f32.mrf.mxu1 }
  0xab   :  { %v147_v24 = vadd.f32 %v146_v23, %v115_v22 }
  0xac   :  { %v178_v25 = vpop.f32.mrf.mxu2 }
  0xad   :  { %v210_v26 = vpop.f32.mrf.mxu3  ;;  %v179_v27 = vadd.f32 %v178_v25, %v91_v14  ;;  %224 = vst [vmem:[%s514_s3 + $0x10] sm:$0xff] %v147_v24 }
  0xaf   :  { %v211_v28 = vadd.f32 %v210_v26, %v179_v27 }
  0xb0   :  { %v117_v29 = vpop.f32.mrf.mxu0 }
  0xb1   :  { %225 = vst [vmem:[%s514_s3 + $0x18] sm:$0xff] %v211_v28  ;;  %v118_v30 = vadd.f32 %v117_v29, %v90_v11 }
  0xb2   :  { %v149_v31 = vpop.f32.mrf.mxu1 }
  0xb3   :  { %v150_v32 = vadd.f32 %v149_v31, %v118_v30 }
  0xb4   :  { %v181_v33 = vpop.f32.mrf.mxu2 }
  0xb5   :  { %v213_v34 = vpop.f32.mrf.mxu3  ;;  %v182_v35 = vadd.f32 %v181_v33, %v91_v14  ;;  %226 = vst [vmem:[%s514_s3 + $0x20] sm:$0xff] %v150_v32 }
  0xb7   :  { %v214_v36 = vadd.f32 %v213_v34, %v182_v35 }
  0xb8   :  { %v120_v37 = vpop.f32.mrf.mxu0 }
  0xb9   :  { %227 = vst [vmem:[%s514_s3 + $0x28] sm:$0xff] %v214_v36  ;;  %v121_v38 = vadd.f32 %v120_v37, %v90_v11 }
  0xba   :  { %v152_v39 = vpop.f32.mrf.mxu1 }
  0xbb   :  { %v153_v40 = vadd.f32 %v152_v39, %v121_v38 }
  0xbc   :  { %v184_v41 = vpop.f32.mrf.mxu2 }
  0xbd   :  { %v216_v42 = vpop.f32.mrf.mxu3  ;;  %v185_v43 = vadd.f32 %v184_v41, %v91_v14  ;;  %228 = vst [vmem:[%s514_s3 + $0x30] sm:$0xff] %v153_v40 }
  0xbf   :  { %v217_v44 = vadd.f32 %v216_v42, %v185_v43 }
  0xc0   :  { %v123_v45 = vpop.f32.mrf.mxu0 }
  0xc1   :  { %229 = vst [vmem:[%s514_s3 + $0x38] sm:$0xff] %v217_v44  ;;  %v124_v46 = vadd.f32 %v123_v45, %v90_v11 }
  0xc2   :  { %v155_v47 = vpop.f32.mrf.mxu1 }
  0xc3   :  { %v156_v48 = vadd.f32 %v155_v47, %v124_v46 }
  0xc4   :  { %v187_v49 = vpop.f32.mrf.mxu2 }
  0xc5   :  { %v219_v50 = vpop.f32.mrf.mxu3  ;;  %v188_v51 = vadd.f32 %v187_v49, %v91_v14  ;;  %230 = vst [vmem:[%s514_s3 + $0x40] sm:$0xff] %v156_v48 }
  0xc7   :  { %v220_v52 = vadd.f32 %v219_v50, %v188_v51 }
  0xc9   :  { %231 = vst [vmem:[%s514_s3 + $0x48] sm:$0xff] %v220_v52 }

</bundles_post_ra>
